<compile_context>
chip_gen: v7x
topology: tpu7x:2x2x1
jax: 0.10.0
libtpu: 0.0.40
codegen_flags: <defaults>
</compile_context>

<pallas_src>
import jax
import jax.numpy as jnp
from jax.experimental import pallas as pl
from jax.experimental.pallas import tpu as pltpu


def _cdiv(a, b):
    return -(-a // b)


def _round_up(n, m):
    return _cdiv(n, m) * m


def _block_diag(w, pack):
    """w: (fin, fout) -> block-diagonal (pack*fin, pack*fout) with `pack`
    copies of w on the diagonal.  One-off, wrapper-side, tiny."""
    fin, fout = w.shape
    eye = jnp.eye(pack, dtype=w.dtype)
    return (eye[:, None, :, None] * w[None, :, None, :]).reshape(
        pack * fin, pack * fout)


def _mlp_kernel(x_ref, w1_ref, b1_ref, w2_ref, b2_ref, w3_ref, b3_ref, o_ref):
    wd = w1_ref.dtype                                      # matmul operand dtype
    # x tile: (m, pack*f_pad) rows-packed, lane-dense.  Cast for the MXU only.
    x = x_ref[...].astype(wd)
    # fc1 -> relu : (m, 128) @ (128, pack*32) -> (m, pack*32), f32 accumulate
    h1 = jnp.dot(x, w1_ref[...], preferred_element_type=jnp.float32)
    h1 = jnp.maximum(h1 + b1_ref[...], 0.0)                # f32 elementwise
    # fc2 -> relu : (m, pack*32) @ (pack*32, pack*64) -> (m, pack*64)
    h2 = jnp.dot(h1.astype(wd), w2_ref[...], preferred_element_type=jnp.float32)
    h2 = jnp.maximum(h2 + b2_ref[...], 0.0)
    # fc3 : (m, pack*64) @ (pack*64, pack) -> (m, pack); row r col q is the
    # scalar output of original row pack*r + q, so (m, pack) reshapes back to
    # (tb, 1) for free on the wrapper side.
    z = jnp.dot(h2.astype(wd), w3_ref[...], preferred_element_type=jnp.float32)
    z = z + b3_ref[...]
    # sigmoid(z) = 0.5*(tanh(z/2)+1): EUP tanh, overflow-safe, no VALU divide.
    o_ref[...] = 0.5 * (jnp.tanh(0.5 * z) + 1.0)


def _ref_forward(x, params):
    w1, b1, w2, b2, w3, b3 = params
    h1 = jnp.maximum(x @ w1.T + b1, 0.0)
    h2 = jnp.maximum(h1 @ w2.T + b2, 0.0)
    return jax.nn.sigmoid(h2 @ w3.T + b3)


def net_forward(x, params, *, block_b=16384, matmul_dtype=jnp.bfloat16,
                min_pallas_batch=1024):
    """Forward of Net (fc1-relu-fc2-relu-fc3-sigmoid). x: (B, f_in) float32.

    params use PyTorch nn.Linear layout: weight (out, in), bias (out,).
    Returns (B, 1) float32.
    """
    w1, b1, w2, b2, w3, b3 = params
    B, f_in = x.shape
    h1d, h2d = w1.shape[0], w2.shape[0]
    assert w1.shape == (h1d, f_in) and w2.shape == (h2d, h1d)
    assert w3.shape == (1, h2d)

    # Small-batch fast path: Pallas dispatch + padding dominate below ~1K rows.
    if B < min_pallas_batch:
        return _ref_forward(x, params)

    # Row-packing factor so pack * f_pad is a whole number of 128-lane words.
    if f_in >= 128:
        f_pad, pack = _round_up(f_in, 128), 1
    else:
        f_pad = next(d for d in (1, 2, 4, 8, 16, 32, 64, 128) if d >= f_in)
        pack = 128 // f_pad

    # --- batch tile: big enough to amortize per-step overhead, but keep the
    # grid at >= 2 steps when B allows it (v7x 2-TC sharding). ---------------
    quant = pack * 128                       # tb quantum -> packed rows % 128 == 0
    block_b = max(quant, _round_up(block_b, quant))
    tb = min(block_b, _round_up(max(1, (B + 1) // 2), quant))
    g = _cdiv(B, tb)
    tb = _round_up(_cdiv(B, g), quant)       # rebalance tiles to minimize padding
    bp = g * tb
    m = tb // pack                           # packed rows per tile

    # --- pad (single fused pass, usually tiny) and take the FREE packed view.
    pad_rows, pad_feat = bp - B, f_pad - f_in
    if pad_rows or pad_feat:
        x = jnp.pad(x, ((0, pad_rows), (0, pad_feat)))
    xp = x.reshape(bp // pack, pack * f_pad)             # contiguous -> no copy

    # --- one-off block-diagonal weights (VMEM-resident, ~0.3 MiB in bf16). --
    wd = matmul_dtype
    w1b = _block_diag(jnp.pad(w1.T, ((0, pad_feat), (0, 0))), pack).astype(wd)
    w2b = _block_diag(w2.T, pack).astype(wd)
    w3b = _block_diag(w3.T, pack).astype(wd)
    b1t = jnp.tile(b1, pack).reshape(1, pack * h1d).astype(jnp.float32)
    b2t = jnp.tile(b2, pack).reshape(1, pack * h2d).astype(jnp.float32)
    b3t = jnp.tile(b3, pack).reshape(1, pack).astype(jnp.float32)

    out = pl.pallas_call(
        _mlp_kernel,
        out_shape=jax.ShapeDtypeStruct((bp // pack, pack), jnp.float32),
        grid=(g,),
        in_specs=[
            # x tile: streamed / double-buffered through the grid.
            pl.BlockSpec((m, pack * f_pad), lambda i: (i, 0)),
            # weights & biases: constant index_maps -> resident, no re-DMA.
            pl.BlockSpec(w1b.shape, lambda i: (0, 0)),
            pl.BlockSpec(b1t.shape, lambda i: (0, 0)),
            pl.BlockSpec(w2b.shape, lambda i: (0, 0)),
            pl.BlockSpec(b2t.shape, lambda i: (0, 0)),
            pl.BlockSpec(w3b.shape, lambda i: (0, 0)),
            pl.BlockSpec(b3t.shape, lambda i: (0, 0)),
        ],
        out_specs=pl.BlockSpec((m, pack), lambda i: (i, 0)),
        compiler_params=pltpu.CompilerParams(
            dimension_semantics=("parallel",),   # shard tiles over v7x's 2 TCs
            vmem_limit_bytes=32 * 1024 * 1024,
        ),
    )(xp, w1b, b1t, w2b, b2t, w3b, b3t)

    # (bp/pack, pack) row-major == original row order -> free reshape + slice.
    return out.reshape(bp, 1)[:B]


def init_params(key, input_shape):
    """PyTorch nn.Linear default init (uniform +-1/sqrt(fan_in)), native
    (out_features, in_features) weight layout."""
    dims = [(input_shape, 32), (32, 64), (64, 1)]
    params = []
    for i, (fan_in, fan_out) in enumerate(dims):
        kw, kb = jax.random.split(jax.random.fold_in(key, i))
        bound = 1.0 / jnp.sqrt(jnp.float32(fan_in))
        w = jax.random.uniform(kw, (fan_out, fan_in), jnp.float32, -bound, bound)
        b = jax.random.uniform(kb, (fan_out,), jnp.float32, -bound, bound)
        params += [w, b]
    return tuple(params)


if __name__ == "__main__":
    key = jax.random.PRNGKey(0)
    batch, input_shape = 8, 16
    kx, kp = jax.random.split(key)
    # Inputs assumed already standardized (StandardScaler is preprocessing,
    # not part of the module's forward).
    x = jax.random.normal(kx, (batch, input_shape), jnp.float32)
    params = init_params(kp, input_shape)
    ref = _ref_forward(x, params)

    # 1) Force the Pallas path at the small shape with exact f32 matmuls.
    out = jax.block_until_ready(
        net_forward(x, params, matmul_dtype=jnp.float32, min_pallas_batch=0))
    assert out.shape == (batch, 1)
    assert jnp.allclose(out, ref, atol=1e-4, rtol=1e-4), float(
        jnp.max(jnp.abs(out - ref)))

    # 2) Default path (bf16 MXU operands, f32 accumulate/elementwise) on a
    #    multi-tile batch: exercises padding, packing and the pipelined grid.
    xb = jax.random.normal(jax.random.fold_in(key, 7), (5000, input_shape),
                           jnp.float32)
    outb = jax.block_until_ready(net_forward(xb, params))
    refb = _ref_forward(xb, params)
    assert outb.shape == (5000, 1)
    assert jnp.allclose(outb, refb, atol=3e-3, rtol=0.0), float(
        jnp.max(jnp.abs(outb - refb)))

    # 3) Small-batch fast path (plain JAX, no dispatch/pad overhead).
    outs = jax.block_until_ready(net_forward(x, params))
    assert jnp.allclose(outs, ref, atol=1e-6, rtol=1e-6)

    print("KERNEL_OK")
</pallas_src>

<mosaic_0001>
module attributes {stable_mosaic.version = 11 : i64} {
  func.func @_mlp_kernel(%arg0: i32, %arg1: memref<128x128xf32, #tpu.memory_space<vmem>>, %arg2: memref<128x256xf32, #tpu.memory_space<vmem>>, %arg3: memref<1x256xf32, #tpu.memory_space<vmem>>, %arg4: memref<256x512xf32, #tpu.memory_space<vmem>>, %arg5: memref<1x512xf32, #tpu.memory_space<vmem>>, %arg6: memref<512x8xf32, #tpu.memory_space<vmem>>, %arg7: memref<1x8xf32, #tpu.memory_space<vmem>>, %arg8: memref<128x8xf32, #tpu.memory_space<vmem>>) attributes {dimension_semantics = [#tpu.dimension_semantics<parallel>], iteration_bounds = array<i64: 1>, scalar_prefetch = 0 : i64, scratch_operands = 0 : i64, tpu.core_type = #tpu.core_type<tc>, window_params = [{transform_indices = @transform_0, window_bounds = array<i64: 128, 128>}, {pipeline_mode = #tpu.pipeline_mode<synchronous>, transform_indices = @transform_1, window_bounds = array<i64: 128, 256>}, {pipeline_mode = #tpu.pipeline_mode<synchronous>, transform_indices = @transform_2, window_bounds = array<i64: 1, 256>}, {pipeline_mode = #tpu.pipeline_mode<synchronous>, transform_indices = @transform_3, window_bounds = array<i64: 256, 512>}, {pipeline_mode = #tpu.pipeline_mode<synchronous>, transform_indices = @transform_4, window_bounds = array<i64: 1, 512>}, {pipeline_mode = #tpu.pipeline_mode<synchronous>, transform_indices = @transform_5, window_bounds = array<i64: 512, 8>}, {pipeline_mode = #tpu.pipeline_mode<synchronous>, transform_indices = @transform_6, window_bounds = array<i64: 1, 8>}, {transform_indices = @transform_7, window_bounds = array<i64: 128, 8>}]} {
    %c0 = arith.constant 0 : index
    %c0_0 = arith.constant 0 : index
    %0 = vector.load %arg1[%c0, %c0_0] : memref<128x128xf32, #tpu.memory_space<vmem>>, vector<128x128xf32>
    %c0_1 = arith.constant 0 : index
    %c0_2 = arith.constant 0 : index
    %1 = vector.load %arg2[%c0_1, %c0_2] : memref<128x256xf32, #tpu.memory_space<vmem>>, vector<128x256xf32>
    %cst = arith.constant dense<0.000000e+00> : vector<128x256xf32>
    %2 = tpu.matmul %0, %1, %cst {dimension_numbers = #tpu.dot_dimension_numbers<[1], [0], [0], [1], [0, 0, 1, 1], [], []>} : vector<128x128xf32>, vector<128x256xf32>, vector<128x256xf32> -> vector<128x256xf32>
    %c0_3 = arith.constant 0 : index
    %c0_4 = arith.constant 0 : index
    %3 = vector.load %arg3[%c0_3, %c0_4] : memref<1x256xf32, #tpu.memory_space<vmem>>, vector<1x256xf32>
    %4 = vector.broadcast %3 : vector<1x256xf32> to vector<128x256xf32>
    %5 = arith.addf %2, %4 : vector<128x256xf32>
    %cst_5 = arith.constant 0.000000e+00 : f32
    %6 = vector.broadcast %cst_5 : f32 to vector<128x256xf32>
    %7 = arith.maximumf %5, %6 : vector<128x256xf32>
    %c0_6 = arith.constant 0 : index
    %c0_7 = arith.constant 0 : index
    %8 = vector.load %arg4[%c0_6, %c0_7] : memref<256x512xf32, #tpu.memory_space<vmem>>, vector<256x512xf32>
    %cst_8 = arith.constant dense<0.000000e+00> : vector<128x512xf32>
    %9 = tpu.matmul %7, %8, %cst_8 {dimension_numbers = #tpu.dot_dimension_numbers<[1], [0], [0], [1], [0, 0, 1, 1], [], []>} : vector<128x256xf32>, vector<256x512xf32>, vector<128x512xf32> -> vector<128x512xf32>
    %c0_9 = arith.constant 0 : index
    %c0_10 = arith.constant 0 : index
    %10 = vector.load %arg5[%c0_9, %c0_10] : memref<1x512xf32, #tpu.memory_space<vmem>>, vector<1x512xf32>
    %11 = vector.broadcast %10 : vector<1x512xf32> to vector<128x512xf32>
    %12 = arith.addf %9, %11 : vector<128x512xf32>
    %cst_11 = arith.constant 0.000000e+00 : f32
    %13 = vector.broadcast %cst_11 : f32 to vector<128x512xf32>
    %14 = arith.maximumf %12, %13 : vector<128x512xf32>
    %c0_12 = arith.constant 0 : index
    %c0_13 = arith.constant 0 : index
    %15 = vector.load %arg6[%c0_12, %c0_13] : memref<512x8xf32, #tpu.memory_space<vmem>>, vector<512x8xf32>
    %cst_14 = arith.constant dense<0.000000e+00> : vector<128x8xf32>
    %16 = tpu.matmul %14, %15, %cst_14 {dimension_numbers = #tpu.dot_dimension_numbers<[1], [0], [0], [1], [0, 0, 1, 1], [], []>} : vector<128x512xf32>, vector<512x8xf32>, vector<128x8xf32> -> vector<128x8xf32>
    %c0_15 = arith.constant 0 : index
    %c0_16 = arith.constant 0 : index
    %17 = vector.load %arg7[%c0_15, %c0_16] : memref<1x8xf32, #tpu.memory_space<vmem>>, vector<1x8xf32>
    %18 = vector.broadcast %17 : vector<1x8xf32> to vector<128x8xf32>
    %19 = arith.addf %16, %18 : vector<128x8xf32>
    %cst_17 = arith.constant 5.000000e-01 : f32
    %20 = vector.broadcast %cst_17 : f32 to vector<128x8xf32>
    %21 = arith.mulf %20, %19 : vector<128x8xf32>
    %22 = math.tanh %21 : vector<128x8xf32>
    %cst_18 = arith.constant 1.000000e+00 : f32
    %23 = vector.broadcast %cst_18 : f32 to vector<128x8xf32>
    %24 = arith.addf %22, %23 : vector<128x8xf32>
    %cst_19 = arith.constant 5.000000e-01 : f32
    %25 = vector.broadcast %cst_19 : f32 to vector<128x8xf32>
    %26 = arith.mulf %25, %24 : vector<128x8xf32>
    %c0_20 = arith.constant 0 : index
    %c0_21 = arith.constant 0 : index
    %27 = vector.load %arg8[%c0_20, %c0_21] : memref<128x8xf32, #tpu.memory_space<vmem>>, vector<128x8xf32>
    tpu.vector_store %arg8[%c0_20, %c0_21], %26 {strides = array<i32>} : memref<128x8xf32, #tpu.memory_space<vmem>>, vector<128x8xf32>,
    return
  }
  func.func @transform_0(%arg0: i32) -> (i32, i32) {
    %c0_i32 = arith.constant 0 : i32
    %c0_i32_0 = arith.constant 0 : i32
    return %arg0, %c0_i32 : i32, i32
  }
  func.func @transform_1(%arg0: i32) -> (i32, i32) {
    %c0_i32 = arith.constant 0 : i32
    %c0_i32_0 = arith.constant 0 : i32
    %c0_i32_1 = arith.constant 0 : i32
    return %c0_i32, %c0_i32_0 : i32, i32
  }
  func.func @transform_2(%arg0: i32) -> (i32, i32) {
    %c0_i32 = arith.constant 0 : i32
    %c0_i32_0 = arith.constant 0 : i32
    %c0_i32_1 = arith.constant 0 : i32
    return %c0_i32, %c0_i32_0 : i32, i32
  }
  func.func @transform_3(%arg0: i32) -> (i32, i32) {
    %c0_i32 = arith.constant 0 : i32
    %c0_i32_0 = arith.constant 0 : i32
    %c0_i32_1 = arith.constant 0 : i32
    return %c0_i32, %c0_i32_0 : i32, i32
  }
  func.func @transform_4(%arg0: i32) -> (i32, i32) {
    %c0_i32 = arith.constant 0 : i32
    %c0_i32_0 = arith.constant 0 : i32
    %c0_i32_1 = arith.constant 0 : i32
    return %c0_i32, %c0_i32_0 : i32, i32
  }
  func.func @transform_5(%arg0: i32) -> (i32, i32) {
    %c0_i32 = arith.constant 0 : i32
    %c0_i32_0 = arith.constant 0 : i32
    %c0_i32_1 = arith.constant 0 : i32
    return %c0_i32, %c0_i32_0 : i32, i32
  }
  func.func @transform_6(%arg0: i32) -> (i32, i32) {
    %c0_i32 = arith.constant 0 : i32
    %c0_i32_0 = arith.constant 0 : i32
    %c0_i32_1 = arith.constant 0 : i32
    return %c0_i32, %c0_i32_0 : i32, i32
  }
  func.func @transform_7(%arg0: i32) -> (i32, i32) {
    %c0_i32 = arith.constant 0 : i32
    %c0_i32_0 = arith.constant 0 : i32
    return %arg0, %c0_i32 : i32, i32
  }
}

</mosaic_0001>

<bundles_post_ra>
// kernel: tpu_custom_call.1
= control target key start
LH: loop header
LB: loop body
LE: loop exit
PB: predicated region body
PF: predicated region fallthrough
CT: control target
= control target key end

     0   :  { %12 = vsyncpa [#allocation3], 0  ;;  %s1737_s24 = smov [#allocation2]   ;;  %s2422_s0 = inlined_call_operand.vmem [shape: f32[128,128], index: 0, kind: input, shape index: {}]   ;;  %s2423_s1 = inlined_call_operand.vmem [shape: f32[128,256], index: 1, kind: input, shape index: {}]   ;;  %s2424_s2 = inlined_call_operand.vmem [shape: f32[1,256], index: 2, kind: input, shape index: {}]   ;;  %s2425_s3 = inlined_call_operand.hbm [shape: f32[256,512], index: 3, kind: input, shape index: {}]   ;;  %s2426_s4 = inlined_call_operand.vmem [shape: f32[1,512], index: 4, kind: input, shape index: {}]   ;;  %s2427_s5 = inlined_call_operand.vmem [shape: f32[512,8], index: 5, kind: input, shape index: {}]   ;;  %s2428_s6 = inlined_call_operand.vmem [shape: f32[1,8], index: 6, kind: input, shape index: {}]   ;;  %s2429_s7 = inlined_call_operand.vmem [shape: f32[128,8], index: 7, kind: output, shape index: {}]  }
   0x1   :  { %s24_s25 = sshll.u32 %s1737_s24, 4  ;;  %s1713_s28 = scalar_lea.hbm %s2425_s3, 16384  ;;  %s25_s25 = int_to_ptr.vmem [resolvable:$true] %s24_s25 }
   0x2   :  { %p1714_p0 = scmp.ne.s32.totalorder %s2425_s3, %s1713_s28  ;;  %p1717_p1 = scmp.lt.u32.totalorder %s1713_s28, %s2425_s3 }
   0x4   :  { %p1719_p2 = pnand %p1717_p1, %p1714_p0 }
   0x6   :  { %1722 = shalt.err (!%p1719_p2)
}
   0x7   :  { %s1723_s10 = scalar_lea.vmem %s25_s25, 16384  ;;  %p1728_p4 = scmp.lt.s32.totalorder %s25_s25, %s25_s25 }
   0x8   :  { %p1724_p3 = scmp.ne.s32.totalorder %s25_s25, %s1723_s10  ;;  %p1729_p5 = scmp.lt.s32.totalorder %s1723_s10, %s1723_s10 }
   0xa   :  { %p1730_p6 = por %p1729_p5, %p1728_p4 }
   0xc   :  { %p1731_p7 = pnand %p1730_p6, %p1724_p3 }
   0xe   :  { %1734 = shalt.err (!%p1731_p7)
}
   0xf   :  { %s1738_s11 = smov 512   ;;  %s1739_s12 = smov 32  }
  0x10   :  { %30 = dma.hbm_to_vmem [thread:$0]  %s2425_s3, 16384, %s25_s25, [#allocation3], %s1738_s11, %s1738_s11, %s1739_s12  }
  0x11   :  { %1735 = dma.done.wait [#allocation3], 16384  }
  0x12   :  { %1736 = vsyncadd [#allocation3], 4294950912  ;;  %v1740_v0 = vmov 0.0   ;;  %v57_v1 = vld [vmem:[%s2423_s1 + $0x8] sm:$0xff]  ;;  %v59_v2 = vld [vmem:[%s2423_s1 + $0x18] sm:$0xff]  ;;  %vm1254_vm0 = vcmask 64512  }
  0x13   :  { %164 = vmatprep.mubr.f32.mxu0 %v1740_v0  ;;  %v56_v3 = vld [vmem:[%s2423_s1] sm:$0xff]  ;;  %v1437_v4 = vpack.c.bf16 %v59_v2, %v57_v1  ;;  %v58_v5 = vld [vmem:[%s2423_s1 + $0x10] sm:$0xff]  ;;  %v61_v6 = vld [vmem:[%s2423_s1 + $0x28] sm:$0xff] }
  0x14   :  { %v63_v7 = vld [vmem:[%s2423_s1 + $0x38] sm:$0xff]  ;;  %v1439_v8 = vpack.c.bf16 %v58_v5, %v56_v3  ;;  %v60_v10 = vld [vmem:[%s2423_s1 + $0x20] sm:$0xff]  ;;  %v62_v11 = vld [vmem:[%s2423_s1 + $0x30] sm:$0xff] }
  0x15   :  { %v1441_v9 = vpack.c.bf16 %v63_v7, %v61_v6  ;;  %v65_v12 = vld [vmem:[%s2423_s1 + $0x48] sm:$0xff]  ;;  %1438 = vmatprep.subr.bf16.mxu0 %v1437_v4  ;;  %v67_v13 = vld [vmem:[%s2423_s1 + $0x58] sm:$0xff]  ;;  %v1443_v14 = vpack.c.bf16 %v62_v11, %v60_v10  ;;  %v64_v16 = vld [vmem:[%s2423_s1 + $0x40] sm:$0xff] }
  0x16   :  { %1440 = vmatpush1.bf16.msra.mxu0 %v1439_v8  ;;  %v1445_v15 = vpack.c.bf16 %v67_v13, %v65_v12  ;;  %v66_v17 = vld [vmem:[%s2423_s1 + $0x50] sm:$0xff]  ;;  %v69_v18 = vld [vmem:[%s2423_s1 + $0x68] sm:$0xff]  ;;  %v71_v19 = vld [vmem:[%s2423_s1 + $0x78] sm:$0xff] }
  0x17   :  { %1442 = vmatprep.subr.bf16.mxu0 %v1441_v9  ;;  %v1447_v20 = vpack.c.bf16 %v66_v17, %v64_v16  ;;  %v1449_v21 = vpack.c.bf16 %v71_v19, %v69_v18  ;;  %v68_v22 = vld [vmem:[%s2423_s1 + $0x60] sm:$0xff]  ;;  %v70_v23 = vld [vmem:[%s2423_s1 + $0x70] sm:$0xff]  ;;  %v73_v24 = vld [vmem:[%s2423_s1 + $0x88] sm:$0xff] }
  0x18   :  { %v75_v25 = vld [vmem:[%s2423_s1 + $0x98] sm:$0xff]  ;;  %v1451_v26 = vpack.c.bf16 %v70_v23, %v68_v22  ;;  %v72_v28 = vld [vmem:[%s2423_s1 + $0x80] sm:$0xff]  ;;  %v74_v29 = vld [vmem:[%s2423_s1 + $0x90] sm:$0xff] }
  0x19   :  { %v1453_v27 = vpack.c.bf16 %v75_v25, %v73_v24  ;;  %v77_v30 = vld [vmem:[%s2423_s1 + $0xa8] sm:$0xff]  ;;  %v79_v31 = vld [vmem:[%s2423_s1 + $0xb8] sm:$0xff]  ;;  %v1455_v32 = vpack.c.bf16 %v74_v29, %v72_v28  ;;  %v76_v33 = vld [vmem:[%s2423_s1 + $0xa0] sm:$0xff] }
  0x1a   :  { %1444 = vmatpush1.bf16.msra.mxu0 %v1443_v14  ;;  %v294_v34 = vld [vmem:[#allocation2 + $0x8] sm:$0xff]  ;;  %v1457_v36 = vpack.c.bf16 %v79_v31, %v77_v30  ;;  %v78_v37 = vld [vmem:[%s2423_s1 + $0xb0] sm:$0xff]  ;;  %v293_v39 = vld [vmem:[#allocation2] sm:$0xff] }
  0x1b   :  { %1446 = vmatprep.subr.bf16.mxu0 %v1445_v15  ;;  %v298_v35 = vld [vmem:[#allocation2 + $0x28] sm:$0xff]  ;;  %v297_v40 = vld [vmem:[#allocation2 + $0x20] sm:$0xff]  ;;  %v83_v42 = vld [vmem:[%s2423_s1 + $0xd8] sm:$0xff]  ;;  %v1459_v46 = vpack.c.bf16 %v78_v37, %v76_v33 }
  0x1c   :  { %v1469_v38 = vpack.c.bf16 %v298_v35, %v294_v34  ;;  %v81_v41 = vld [vmem:[%s2423_s1 + $0xc8] sm:$0xff]  ;;  %v1471_v43 = vpack.c.bf16 %v297_v40, %v293_v39  ;;  %v80_v47 = vld [vmem:[%s2423_s1 + $0xc0] sm:$0xff]  ;;  %v82_v52 = vld [vmem:[%s2423_s1 + $0xd0] sm:$0xff] }
  0x1d   :  { %v302_v44 = vld [vmem:[#allocation2 + $0x48] sm:$0xff]  ;;  %v301_v49 = vld [vmem:[#allocation2 + $0x40] sm:$0xff]  ;;  %v1461_v51 = vpack.c.bf16 %v83_v42, %v81_v41  ;;  %v87_v57 = vld [vmem:[%s2423_s1 + $0xf8] sm:$0xff]  ;;  %v1463_v61 = vpack.c.bf16 %v82_v52, %v80_v47 }
  0x1e   :  { %1448 = vmatpush1.bf16.msra.mxu0 %v1447_v20  ;;  %1470 = vmatprep.subr.bf16.mxu1 %v1469_v38  ;;  %v306_v45 = vld [vmem:[#allocation2 + $0x68] sm:$0xff]  ;;  %v305_v50 = vld [vmem:[#allocation2 + $0x60] sm:$0xff]  ;;  %v86_v4 = vld [vmem:[%s2423_s1 + $0xf0] sm:$0xff] }
  0x1f   :  { %1450 = vmatprep.subr.bf16.mxu0 %v1449_v21  ;;  %1472 = vmatpush1.bf16.msra.mxu1 %v1471_v43  ;;  %v1473_v48 = vpack.c.bf16 %v306_v45, %v302_v44  ;;  %v1475_v53 = vpack.c.bf16 %v305_v50, %v301_v49  ;;  %v310_v54 = vld [vmem:[#allocation2 + $0x88] sm:$0xff]  ;;  %v309_v59 = vld [vmem:[#allocation2 + $0x80] sm:$0xff]  ;;  %v296_v8 = vld [vmem:[#allocation2 + $0x18] sm:$0xff] }
  0x20   :  { %v314_v55 = vld [vmem:[#allocation2 + $0xa8] sm:$0xff]  ;;  %v313_v60 = vld [vmem:[#allocation2 + $0xa0] sm:$0xff]  ;;  %v300_v9 = vld [vmem:[#allocation2 + $0x38] sm:$0xff] }
  0x21   :  { %v85_v56 = vld [vmem:[%s2423_s1 + $0xe8] sm:$0xff]  ;;  %1474 = vmatprep.subr.bf16.mxu1 %v1473_v48  ;;  %v1477_v58 = vpack.c.bf16 %v314_v55, %v310_v54  ;;  %v84_v62 = vld [vmem:[%s2423_s1 + $0xe0] sm:$0xff]  ;;  %v1479_v63 = vpack.c.bf16 %v313_v60, %v309_v59  ;;  %v1533_v14 = vpack.c.bf16 %v300_v9, %v296_v8  ;;  %v295_v15 = vld [vmem:[#allocation2 + $0x10] sm:$0xff] }
  0x22   :  { %1452 = vmatpush1.bf16.msra.mxu0 %v1451_v26  ;;  %v318_v1 = vld [vmem:[#allocation2 + $0xc8] sm:$0xff]  ;;  %v1465_v3 = vpack.c.bf16 %v87_v57, %v85_v56  ;;  %v317_v6 = vld [vmem:[#allocation2 + $0xc0] sm:$0xff]  ;;  %v1467_v12 = vpack.c.bf16 %v86_v4, %v84_v62  ;;  %v299_v16 = vld [vmem:[#allocation2 + $0x30] sm:$0xff] }
  0x23   :  { %1454 = vmatprep.subr.bf16.mxu0 %v1453_v27  ;;  %1476 = vmatpush1.bf16.msra.mxu1 %v1475_v53  ;;  %v322_v2 = vld [vmem:[#allocation2 + $0xe8] sm:$0xff]  ;;  %v321_v7 = vld [vmem:[#allocation2 + $0xe0] sm:$0xff]  ;;  %v304_v17 = vld [vmem:[#allocation2 + $0x58] sm:$0xff]  ;;  %v1535_v25 = vpack.c.bf16 %v299_v16, %v295_v15 }
  0x24   :  { %1478 = vmatprep.subr.bf16.mxu1 %v1477_v58  ;;  %v1481_v5 = vpack.c.bf16 %v322_v2, %v318_v1  ;;  %v326_v10 = vld [vmem:[#allocation2 + $0x108] sm:$0xff]  ;;  %v1483_v13 = vpack.c.bf16 %v321_v7, %v317_v6  ;;  %v308_v19 = vld [vmem:[#allocation2 + $0x78] sm:$0xff]  ;;  %v325_v20 = vld [vmem:[#allocation2 + $0x100] sm:$0xff] }
  0x25   :  { %v330_v11 = vld [vmem:[#allocation2 + $0x128] sm:$0xff]  ;;  %v329_v21 = vld [vmem:[#allocation2 + $0x120] sm:$0xff]  ;;  %v1537_v26 = vpack.c.bf16 %v308_v19, %v304_v17  ;;  %v303_v27 = vld [vmem:[#allocation2 + $0x50] sm:$0xff] }
  0x26   :  { %1456 = vmatpush1.bf16.msra.mxu0 %v1455_v32  ;;  %v1485_v18 = vpack.c.bf16 %v330_v11, %v326_v10  ;;  %v334_v22 = vld [vmem:[#allocation2 + $0x148] sm:$0xff]  ;;  %v40_v24 = vld [vmem:[%s2422_s0] sm:$0xff]  ;;  %v307_v28 = vld [vmem:[#allocation2 + $0x70] sm:$0xff]  ;;  %v1487_v30 = vpack.c.bf16 %v329_v21, %v325_v20 }
  0x27   :  { %1458 = vmatprep.subr.bf16.mxu0 %v1457_v36  ;;  %1480 = vmatpush1.bf16.msra.mxu1 %v1479_v63  ;;  %v338_v23 = vld [vmem:[#allocation2 + $0x168] sm:$0xff]  ;;  %v312_v29 = vld [vmem:[#allocation2 + $0x98] sm:$0xff]  ;;  %v333_v33 = vld [vmem:[#allocation2 + $0x140] sm:$0xff]  ;;  %v1539_v38 = vpack.c.bf16 %v307_v28, %v303_v27 }
  0x28   :  { %1482 = vmatprep.subr.bf16.mxu1 %v1481_v5  ;;  %v316_v31 = vld [vmem:[#allocation2 + $0xb8] sm:$0xff]  ;;  %v1489_v32 = vpack.c.bf16 %v338_v23, %v334_v22  ;;  %v337_v34 = vld [vmem:[#allocation2 + $0x160] sm:$0xff]  ;;  %v342_v35 = vld [vmem:[#allocation2 + $0x188] sm:$0xff] }
  0x29   :  { %v346_v36 = vld [vmem:[#allocation2 + $0x1a8] sm:$0xff]  ;;  %v1541_v39 = vpack.c.bf16 %v316_v31, %v312_v29  ;;  %v311_v40 = vld [vmem:[#allocation2 + $0x90] sm:$0xff]  ;;  %v320_v42 = vld [vmem:[#allocation2 + $0xd8] sm:$0xff]  ;;  %v1491_v43 = vpack.c.bf16 %v337_v34, %v333_v33 }
  0x2a   :  { %1460 = vmatpush1.bf16.msra.mxu0 %v1459_v46  ;;  %v41_v37 = vld [vmem:[%s2422_s0 + $0x8] sm:$0xff]  ;;  %v315_v41 = vld [vmem:[#allocation2 + $0xb0] sm:$0xff]  ;;  %v324_v44 = vld [vmem:[#allocation2 + $0xf8] sm:$0xff]  ;;  %v1493_v45 = vpack.c.bf16 %v346_v36, %v342_v35 }
  0x2b   :  { %1462 = vmatprep.subr.bf16.mxu0 %v1461_v51  ;;  %1484 = vmatpush1.bf16.msra.mxu1 %v1483_v13  ;;  %v341_v46 = vld [vmem:[#allocation2 + $0x180] sm:$0xff]  ;;  %v350_v48 = vld [vmem:[#allocation2 + $0x1c8] sm:$0xff]  ;;  %v42_v50 = vld [vmem:[%s2422_s0 + $0x10] sm:$0xff]  ;;  %v1543_v51 = vpack.c.bf16 %v315_v41, %v311_v40  ;;  %v1545_v52 = vpack.c.bf16 %v324_v44, %v320_v42 }
  0x2c   :  { %1486 = vmatprep.subr.bf16.mxu1 %v1485_v18  ;;  %v345_v47 = vld [vmem:[#allocation2 + $0x1a0] sm:$0xff]  ;;  %v354_v49 = vld [vmem:[#allocation2 + $0x1e8] sm:$0xff]  ;;  %v319_v53 = vld [vmem:[#allocation2 + $0xd0] sm:$0xff] }
  0x2d   :  { %v323_v54 = vld [vmem:[#allocation2 + $0xf0] sm:$0xff]  ;;  %v328_v55 = vld [vmem:[#allocation2 + $0x118] sm:$0xff]  ;;  %v1495_v56 = vpack.c.bf16 %v345_v47, %v341_v46  ;;  %v1497_v58 = vpack.c.bf16 %v354_v49, %v350_v48  ;;  %v349_v59 = vld [vmem:[#allocation2 + $0x1c0] sm:$0xff] }
  0x2e   :  { %1464 = vmatpush1.bf16.msra.mxu0 %v1463_v61  ;;  %v332_v57 = vld [vmem:[#allocation2 + $0x138] sm:$0xff]  ;;  %v353_v60 = vld [vmem:[#allocation2 + $0x1e0] sm:$0xff]  ;;  %v358_v61 = vld [vmem:[#allocation2 + $0x208] sm:$0xff]  ;;  %v1547_v1 = vpack.c.bf16 %v323_v54, %v319_v53 }
  0x2f   :  { %1466 = vmatprep.subr.bf16.mxu0 %v1465_v3  ;;  %1488 = vmatpush1.bf16.msra.mxu1 %v1487_v30  ;;  %v362_v62 = vld [vmem:[#allocation2 + $0x228] sm:$0xff]  ;;  %v43_v63 = vld [vmem:[%s2422_s0 + $0x18] sm:$0xff]  ;;  %v1549_v2 = vpack.c.bf16 %v332_v57, %v328_v55  ;;  %v327_v3 = vld [vmem:[#allocation2 + $0x110] sm:$0xff]  ;;  %v1499_v6 = vpack.c.bf16 %v353_v60, %v349_v59 }
  0x30   :  { %1490 = vmatprep.subr.bf16.mxu1 %v1489_v32  ;;  %v331_v4 = vld [vmem:[#allocation2 + $0x130] sm:$0xff]  ;;  %v336_v5 = vld [vmem:[#allocation2 + $0x158] sm:$0xff]  ;;  %v1501_v8 = vpack.c.bf16 %v362_v62, %v358_v61  ;;  %v357_v9 = vld [vmem:[#allocation2 + $0x200] sm:$0xff] }
  0x31   :  { %v340_v7 = vld [vmem:[#allocation2 + $0x178] sm:$0xff]  ;;  %v361_v10 = vld [vmem:[#allocation2 + $0x220] sm:$0xff]  ;;  %v366_v11 = vld [vmem:[#allocation2 + $0x248] sm:$0xff] }
  0x32   :  { %1468 = vmatpush1.bf16.msra.mxu0 %v1467_v12  ;;  %v370_v12 = vld [vmem:[#allocation2 + $0x268] sm:$0xff]  ;;  %v44_v13 = vld [vmem:[%s2422_s0 + $0x20] sm:$0xff]  ;;  %v1553_v15 = vpack.c.bf16 %v340_v7, %v336_v5  ;;  %v335_v16 = vld [vmem:[#allocation2 + $0x150] sm:$0xff]  ;;  %v1503_v19 = vpack.c.bf16 %v361_v10, %v357_v9 }
  0x33   :  { %1534 = vmatprep.subr.bf16.mxu0 %v1533_v14  ;;  %1492 = vmatpush1.bf16.msra.mxu1 %v1491_v43  ;;  %v1551_v14 = vpack.c.bf16 %v331_v4, %v327_v3  ;;  %v339_v17 = vld [vmem:[#allocation2 + $0x170] sm:$0xff]  ;;  %v344_v18 = vld [vmem:[#allocation2 + $0x198] sm:$0xff]  ;;  %v1505_v21 = vpack.c.bf16 %v370_v12, %v366_v11  ;;  %v365_v22 = vld [vmem:[#allocation2 + $0x240] sm:$0xff] }
  0x34   :  { %1494 = vmatprep.subr.bf16.mxu1 %v1493_v45  ;;  %v348_v20 = vld [vmem:[#allocation2 + $0x1b8] sm:$0xff]  ;;  %v369_v23 = vld [vmem:[#allocation2 + $0x260] sm:$0xff]  ;;  %v1555_v27 = vpack.c.bf16 %v339_v17, %v335_v16  ;;  %v343_v29 = vld [vmem:[#allocation2 + $0x190] sm:$0xff] }
  0x35   :  { %165 = vmatmul.mubr.f32.vlgmr.msra.gmra.mrb[0].mxu0 %v40_v24  ;;  %v374_v24 = vld [vmem:[#allocation2 + $0x288] sm:$0xff]  ;;  %v1557_v28 = vpack.c.bf16 %v348_v20, %v344_v18  ;;  %v347_v30 = vld [vmem:[#allocation2 + $0x1b0] sm:$0xff]  ;;  %v352_v31 = vld [vmem:[#allocation2 + $0x1d8] sm:$0xff]  ;;  %v1507_v32 = vpack.c.bf16 %v369_v23, %v365_v22 }
  0x36   :  { %170 = vmatprep.mubr.f32.mxu0 %v1740_v0  ;;  %1536 = vmatpush1.bf16.msra.mxu0 %v1535_v25  ;;  %v378_v25 = vld [vmem:[#allocation2 + $0x2a8] sm:$0xff]  ;;  %v356_v33 = vld [vmem:[#allocation2 + $0x1f8] sm:$0xff]  ;;  %v373_v35 = vld [vmem:[#allocation2 + $0x280] sm:$0xff]  ;;  %v1559_v40 = vpack.c.bf16 %v347_v30, %v343_v29 }
  0x37   :  { %1538 = vmatprep.subr.bf16.mxu0 %v1537_v26  ;;  %1496 = vmatpush1.bf16.msra.mxu1 %v1495_v56  ;;  %v45_v26 = vld [vmem:[%s2422_s0 + $0x28] sm:$0xff]  ;;  %v1509_v34 = vpack.c.bf16 %v378_v25, %v374_v24  ;;  %v377_v36 = vld [vmem:[#allocation2 + $0x2a0] sm:$0xff]  ;;  %v1561_v41 = vpack.c.bf16 %v356_v33, %v352_v31  ;;  %v351_v42 = vld [vmem:[#allocation2 + $0x1d0] sm:$0xff] }
  0x38   :  { %1498 = vmatprep.subr.bf16.mxu1 %v1497_v58  ;;  %v355_v43 = vld [vmem:[#allocation2 + $0x1f0] sm:$0xff]  ;;  %v360_v44 = vld [vmem:[#allocation2 + $0x218] sm:$0xff]  ;;  %v1511_v45 = vpack.c.bf16 %v377_v36, %v373_v35  ;;  %v381_v48 = vld [vmem:[#allocation2 + $0x2c0] sm:$0xff] }
  0x39   :  { %171 = vmatmul.mubr.f32.gmra.mrb[2].mxu0 %v41_v37  ;;  %v382_v37 = vld [vmem:[#allocation2 + $0x2c8] sm:$0xff]  ;;  %v364_v46 = vld [vmem:[#allocation2 + $0x238] sm:$0xff]  ;;  %v385_v49 = vld [vmem:[#allocation2 + $0x2e0] sm:$0xff]  ;;  %v1563_v53 = vpack.c.bf16 %v355_v43, %v351_v42 }
  0x3a   :  { %176 = vmatprep.mubr.f32.mxu0 %v1740_v0  ;;  %1540 = vmatpush1.bf16.msra.mxu0 %v1539_v38  ;;  %v386_v38 = vld [vmem:[#allocation2 + $0x2e8] sm:$0xff]  ;;  %v1565_v54 = vpack.c.bf16 %v364_v46, %v360_v44  ;;  %v359_v55 = vld [vmem:[#allocation2 + $0x210] sm:$0xff]  ;;  %v368_v57 = vld [vmem:[#allocation2 + $0x258] sm:$0xff]  ;;  %v1515_v58 = vpack.c.bf16 %v385_v49, %v381_v48 }
  0x3b   :  { %1542 = vmatprep.subr.bf16.mxu0 %v1541_v39  ;;  %1500 = vmatpush1.bf16.msra.mxu1 %v1499_v6  ;;  %v46_v39 = vld [vmem:[%s2422_s0 + $0x30] sm:$0xff]  ;;  %v1513_v47 = vpack.c.bf16 %v386_v38, %v382_v37  ;;  %v372_v59 = vld [vmem:[#allocation2 + $0x278] sm:$0xff]  ;;  %v389_v61 = vld [vmem:[#allocation2 + $0x300] sm:$0xff] }
  0x3c   :  { %1502 = vmatprep.subr.bf16.mxu1 %v1501_v8  ;;  %v363_v56 = vld [vmem:[#allocation2 + $0x230] sm:$0xff]  ;;  %v393_v62 = vld [vmem:[#allocation2 + $0x320] sm:$0xff]  ;;  %v1569_v4 = vpack.c.bf16 %v372_v59, %v368_v57  ;;  %v376_v7 = vld [vmem:[#allocation2 + $0x298] sm:$0xff] }
  0x3d   :  { %177 = vmatmul.mubr.f32.gmra.mrb[4].mxu0 %v42_v50  ;;  %v390_v50 = vld [vmem:[#allocation2 + $0x308] sm:$0xff]  ;;  %v1567_v3 = vpack.c.bf16 %v363_v56, %v359_v55  ;;  %v367_v5 = vld [vmem:[#allocation2 + $0x250] sm:$0xff]  ;;  %v1519_v8 = vpack.c.bf16 %v393_v62, %v389_v61  ;;  %v380_v9 = vld [vmem:[#allocation2 + $0x2b8] sm:$0xff] }
  0x3e   :  { %182 = vmatprep.mubr.f32.mxu0 %v1740_v0  ;;  %1544 = vmatpush1.bf16.msra.mxu0 %v1543_v51  ;;  %v394_v51 = vld [vmem:[#allocation2 + $0x328] sm:$0xff]  ;;  %v371_v6 = vld [vmem:[#allocation2 + $0x270] sm:$0xff]  ;;  %v397_v11 = vld [vmem:[#allocation2 + $0x340] sm:$0xff]  ;;  %v1573_v17 = vpack.c.bf16 %v380_v9, %v376_v7 }
  0x3f   :  { %1546 = vmatprep.subr.bf16.mxu0 %v1545_v52  ;;  %1504 = vmatpush1.bf16.msra.mxu1 %v1503_v19  ;;  %v47_v52 = vld [vmem:[%s2422_s0 + $0x38] sm:$0xff]  ;;  %v1517_v60 = vpack.c.bf16 %v394_v51, %v390_v50  ;;  %v401_v12 = vld [vmem:[#allocation2 + $0x360] sm:$0xff]  ;;  %v1571_v16 = vpack.c.bf16 %v371_v6, %v367_v5  ;;  %v375_v18 = vld [vmem:[#allocation2 + $0x290] sm:$0xff] }
  0x40   :  { %1506 = vmatprep.subr.bf16.mxu1 %v1505_v21  ;;  %v379_v19 = vld [vmem:[#allocation2 + $0x2b0] sm:$0xff]  ;;  %v1523_v20 = vpack.c.bf16 %v401_v12, %v397_v11  ;;  %v384_v21 = vld [vmem:[#allocation2 + $0x2d8] sm:$0xff]  ;;  %v52_v38 = vld [vmem:[%s2422_s0 + $0x60] sm:$0xff] }
  0x41   :  { %183 = vmatmul.mubr.f32.gmra.mrb[6].mxu0 %v43_v63  ;;  %v398_v63 = vld [vmem:[#allocation2 + $0x348] sm:$0xff]  ;;  %v388_v22 = vld [vmem:[#allocation2 + $0x2f8] sm:$0xff]  ;;  %v50_v24 = vld [vmem:[%s2422_s0 + $0x50] sm:$0xff]  ;;  %v1575_v25 = vpack.c.bf16 %v379_v19, %v375_v18 }
  0x42   :  { %188 = vmatprep.mubr.f32.mxu0 %v1740_v0  ;;  %1548 = vmatpush1.bf16.msra.mxu0 %v1547_v1  ;;  %v402_v1 = vld [vmem:[#allocation2 + $0x368] sm:$0xff]  ;;  %v392_v29 = vld [vmem:[#allocation2 + $0x318] sm:$0xff]  ;;  %v395_v35 = vld [vmem:[#allocation2 + $0x330] sm:$0xff] }
  0x43   :  { %1550 = vmatprep.subr.bf16.mxu0 %v1549_v2  ;;  %1508 = vmatpush1.bf16.msra.mxu1 %v1507_v32  ;;  %v48_v2 = vld [vmem:[%s2422_s0 + $0x40] sm:$0xff]  ;;  %v1521_v10 = vpack.c.bf16 %v402_v1, %v398_v63  ;;  %v396_v30 = vld [vmem:[#allocation2 + $0x338] sm:$0xff]  ;;  %v403_v42 = vld [vmem:[#allocation2 + $0x370] sm:$0xff] }
  0x44   :  { %1510 = vmatprep.subr.bf16.mxu1 %v1509_v34  ;;  %v51_v31 = vld [vmem:[%s2422_s0 + $0x58] sm:$0xff]  ;;  %v1581_v33 = vpack.c.bf16 %v396_v30, %v392_v29  ;;  %v391_v34 = vld [vmem:[#allocation2 + $0x310] sm:$0xff]  ;;  %v405_v50 = vld [vmem:[#allocation2 + $0x380] sm:$0xff] }
  0x45   :  { %189 = vmatmul.mubr.f32.gmra.mrb[8].mxu0 %v44_v13  ;;  %v406_v13 = vld [vmem:[#allocation2 + $0x388] sm:$0xff]  ;;  %v400_v36 = vld [vmem:[#allocation2 + $0x358] sm:$0xff]  ;;  %v54_v48 = vld [vmem:[%s2422_s0 + $0x70] sm:$0xff] }
  0x46   :  { %194 = vmatprep.mubr.f32.mxu0 %v1740_v0  ;;  %1552 = vmatpush1.bf16.msra.mxu0 %v1551_v14  ;;  %v410_v14 = vld [vmem:[#allocation2 + $0x3a8] sm:$0xff]  ;;  %v404_v37 = vld [vmem:[#allocation2 + $0x378] sm:$0xff]  ;;  %v409_v51 = vld [vmem:[#allocation2 + $0x3a0] sm:$0xff] }
  0x47   :  { %1554 = vmatprep.subr.bf16.mxu0 %v1553_v15  ;;  %1512 = vmatpush1.bf16.msra.mxu1 %v1511_v45  ;;  %v49_v15 = vld [vmem:[%s2422_s0 + $0x48] sm:$0xff]  ;;  %v1525_v23 = vpack.c.bf16 %v410_v14, %v406_v13  ;;  %v408_v43 = vld [vmem:[#allocation2 + $0x398] sm:$0xff]  ;;  %v413_v61 = vld [vmem:[#allocation2 + $0x3c0] sm:$0xff] }
  0x48   :  { %1514 = vmatprep.subr.bf16.mxu1 %v1513_v47  ;;  %v412_v44 = vld [vmem:[#allocation2 + $0x3b8] sm:$0xff]  ;;  %v53_v45 = vld [vmem:[%s2422_s0 + $0x68] sm:$0xff]  ;;  %v415_v1 = vld [vmem:[#allocation2 + $0x3d0] sm:$0xff] }
  0x49   :  { %195 = vmatmul.mubr.f32.gmra.mrb[10].mxu0 %v45_v26  ;;  %v1577_v26 = vpack.c.bf16 %v388_v22, %v384_v21  ;;  %v1589_v47 = vpack.c.bf16 %v412_v44, %v408_v43  ;;  %v55_v49 = vld [vmem:[%s2422_s0 + $0x78] sm:$0xff]  ;;  %v414_v56 = vld [vmem:[#allocation2 + $0x3c8] sm:$0xff]  ;;  %v877_v7 = vld [vmem:[%s2427_s5 + $0x180] sm:$0xff] }
  0x4a   :  { %200 = vmatprep.mubr.f32.mxu0 %v1740_v0  ;;  %1556 = vmatpush1.bf16.msra.mxu0 %v1555_v27  ;;  %v383_v27 = vld [vmem:[#allocation2 + $0x2d0] sm:$0xff]  ;;  %v418_v57 = vld [vmem:[#allocation2 + $0x3e8] sm:$0xff]  ;;  %v88_v13 = vld [vmem:[%s2424_s2] sm:$0x3] }
  0x4b   :  { %1558 = vmatprep.subr.bf16.mxu0 %v1557_v28  ;;  %1516 = vmatpush1.bf16.msra.mxu1 %v1515_v58  ;;  %v387_v28 = vld [vmem:[#allocation2 + $0x2f0] sm:$0xff]  ;;  %v416_v58 = vld [vmem:[#allocation2 + $0x3d8] sm:$0xff]  ;;  %v1529_v59 = vpack.c.bf16 %v418_v57, %v414_v56  ;;  %v846_v5 = vld [vmem:[%s2427_s5 + $0x88] sm:$0xff] }
  0x4c   :  { %1518 = vmatprep.subr.bf16.mxu1 %v1517_v60  ;;  %v1579_v32 = vpack.c.bf16 %v387_v28, %v383_v27  ;;  %v420_v60 = vld [vmem:[#allocation2 + $0x3f8] sm:$0xff]  ;;  %v829_v18 = vld [vmem:[%s2427_s5] sm:$0xff]  ;;  %v830_v19 = vld [vmem:[%s2427_s5 + $0x8] sm:$0xff] }
  0x4d   :  { %201 = vmatmul.mubr.f32.gmra.mrb[12].mxu0 %v46_v39  ;;  %v1583_v39 = vpack.c.bf16 %v395_v35, %v391_v34  ;;  %v1593_v62 = vpack.c.bf16 %v420_v60, %v416_v58  ;;  %v847_v22 = vld [vmem:[%s2427_s5 + $0x90] sm:$0xff]  ;;  %v880_v28 = vld [vmem:[%s2427_s5 + $0x198] sm:$0xff]  ;;  %v850_v44 = vld [vmem:[%s2427_s5 + $0xa8] sm:$0xff] }
  0x4e   :  { %206 = vmatprep.mubr.f32.mxu0 %v1740_v0  ;;  %1560 = vmatpush1.bf16.msra.mxu0 %v1559_v40  ;;  %v1585_v40 = vpack.c.bf16 %v404_v37, %v400_v36  ;;  %v879_v27 = vld [vmem:[%s2427_s5 + $0x190] sm:$0xff]  ;;  %v866_v60 = vld [vmem:[%s2427_s5 + $0x128] sm:$0xff] }
  0x4f   :  { %1562 = vmatprep.subr.bf16.mxu0 %v1561_v41  ;;  %1520 = vmatpush1.bf16.msra.mxu1 %v1519_v8  ;;  %v399_v41 = vld [vmem:[#allocation2 + $0x350] sm:$0xff]  ;;  %v878_v8 = vld [vmem:[%s2427_s5 + $0x188] sm:$0xff] }
  0x50   :  { %1522 = vmatprep.subr.bf16.mxu1 %v1521_v10  ;;  %v1587_v46 = vpack.c.bf16 %v403_v42, %v399_v41  ;;  %v1965_v9 = vpack.c.bf16 %v878_v8, %v877_v7  ;;  %v90_v10 = vlaneseq  ;;  %v863_v41 = vld [vmem:[%s2427_s5 + $0x110] sm:$0xff]  ;;  %v864_v42 = vld [vmem:[%s2427_s5 + $0x118] sm:$0xff] }
  0x51   :  { %207 = vmatmul.mubr.f32.gmra.mrb[14].mxu0 %v47_v52  ;;  %v407_v52 = vld [vmem:[#allocation2 + $0x390] sm:$0xff] }
  0x52   :  { %212 = vmatprep.mubr.f32.mxu0 %v1740_v0  ;;  %1564 = vmatpush1.bf16.msra.mxu0 %v1563_v53  ;;  %v1527_v53 = vpack.c.bf16 %v409_v51, %v405_v50  ;;  %v1968_v11 = vshrl.u32 %v90_v10, 7  ;;  %v833_v50 = vld [vmem:[%s2427_s5 + $0x20] sm:$0xff]  ;;  %v834_v51 = vld [vmem:[%s2427_s5 + $0x28] sm:$0xff]  ;;  %v851_v57 = vld [vmem:[%s2427_s5 + $0xb0] sm:$0xff] }
  0x53   :  { %1566 = vmatprep.subr.bf16.mxu0 %v1565_v54  ;;  %1524 = vmatpush1.bf16.msra.mxu1 %v1523_v20  ;;  %v411_v54 = vld [vmem:[#allocation2 + $0x3b0] sm:$0xff] }
  0x54   :  { %1526 = vmatprep.subr.bf16.mxu1 %v1525_v23  ;;  %v1591_v55 = vpack.c.bf16 %v411_v54, %v407_v52  ;;  %v92_v12 = vsub.s32 0, %v1968_v11  ;;  %v96_v14 = vsub.s32 1, %v1968_v11  ;;  %v861_v23 = vld [vmem:[%s2427_s5 + $0x100] sm:$0xff]  ;;  %v2046_v52 = vpack.c.bf16 %v864_v42, %v863_v41  ;;  %v856_v42 = vld [vmem:[%s2427_s5 + $0xd8] sm:$0xff] }
  0x55   :  { %213 = vmatmul.mubr.f32.gmra.mrb[16].mxu0 %v48_v2  ;;  %v419_v2 = vld [vmem:[#allocation2 + $0x3f0] sm:$0xff] }
  0x56   :  { %218 = vmatprep.mubr.f32.mxu0 %v1740_v0  ;;  %1568 = vmatpush1.bf16.msra.mxu0 %v1567_v3  ;;  %v1595_v3 = vpack.c.bf16 %v419_v2, %v415_v1 }
  0x57   :  { %1570 = vmatprep.subr.bf16.mxu0 %v1569_v4  ;;  %1528 = vmatpush1.bf16.msra.mxu1 %v1527_v53  ;;  %v845_v4 = vld [vmem:[%s2427_s5 + $0x80] sm:$0xff] }
  0x58   :  { %1530 = vmatprep.subr.bf16.mxu1 %v1529_v59  ;;  %v1597_v6 = vpack.c.bf16 %v846_v5, %v845_v4  ;;  %v865_v59 = vld [vmem:[%s2427_s5 + $0x120] sm:$0xff]  ;;  %v835_v4 = vld [vmem:[%s2427_s5 + $0x30] sm:$0xff]  ;;  %v836_v5 = vld [vmem:[%s2427_s5 + $0x38] sm:$0xff] }
  0x59   :  { %219 = vmatmul.mubr.f32.gmra.mrb[18].mxu0 %v49_v15  ;;  %v1977_v15 = vrot.slane %v88_v13, %v92_v12 }
  0x5a   :  { %224 = vmatprep.mubr.f32.mxu0 %v1740_v0  ;;  %1572 = vmatpush1.bf16.msra.mxu0 %v1571_v16  ;;  %v1981_v16 = vrot.slane %v88_v13, %v96_v14 }
  0x5b   :  { %1574 = vmatprep.subr.bf16.mxu0 %v1573_v17 }
  0x5d   :  { %225 = vmatmul.mubr.f32.gmra.mrb[20].mxu0 %v50_v24  ;;  %v862_v24 = vld [vmem:[%s2427_s5 + $0x108] sm:$0xff] }
  0x5e   :  { %230 = vmatprep.mubr.f32.mxu0 %v1740_v0  ;;  %1576 = vmatpush1.bf16.msra.mxu0 %v1575_v25  ;;  %v2015_v34 = vpack.c.bf16 %v862_v24, %v861_v23  ;;  %v885_v23 = vld [vmem:[%s2427_s5 + $0x1c0] sm:$0xff]  ;;  %v886_v24 = vld [vmem:[%s2427_s5 + $0x1c8] sm:$0xff] }
  0x5f   :  { %1578 = vmatprep.subr.bf16.mxu0 %v1577_v26  ;;  %v848_v26 = vld [vmem:[%s2427_s5 + $0x98] sm:$0xff] }
  0x61   :  { %231 = vmatmul.mubr.f32.gmra.mrb[22].mxu0 %v51_v31  ;;  %v1599_v31 = vpack.c.bf16 %v830_v19, %v829_v18  ;;  %v867_v19 = vld [vmem:[%s2427_s5 + $0x130] sm:$0xff] }
  0x62   :  { %236 = vmatprep.mubr.f32.mxu0 %v1740_v0  ;;  %1580 = vmatpush1.bf16.msra.mxu0 %v1579_v32  ;;  %v831_v32 = vld [vmem:[%s2427_s5 + $0x10] sm:$0xff] }
  0x63   :  { %1582 = vmatprep.subr.bf16.mxu0 %v1581_v33  ;;  %v832_v33 = vld [vmem:[%s2427_s5 + $0x18] sm:$0xff] }
  0x65   :  { %237 = vmatmul.mubr.f32.gmra.mrb[24].mxu0 %v52_v38  ;;  %v1601_v38 = vpack.c.bf16 %v848_v26, %v847_v22  ;;  %v854_v22 = vld [vmem:[%s2427_s5 + $0xc8] sm:$0xff] }
  0x66   :  { %242 = vmatprep.mubr.f32.mxu0 %v1740_v0  ;;  %1584 = vmatpush1.bf16.msra.mxu0 %v1583_v39  ;;  %v849_v39 = vld [vmem:[%s2427_s5 + $0xa0] sm:$0xff] }
  0x67   :  { %1586 = vmatprep.subr.bf16.mxu0 %v1585_v40  ;;  %v2021_v40 = vpack.c.bf16 %v880_v28, %v879_v27  ;;  %v1605_v56 = vpack.c.bf16 %v850_v44, %v849_v39  ;;  %v1611_v27 = vpack.c.bf16 %v836_v5, %v835_v4  ;;  %v837_v28 = vld [vmem:[%s2427_s5 + $0x40] sm:$0xff]  ;;  %v870_v39 = vld [vmem:[%s2427_s5 + $0x148] sm:$0xff]  ;;  %v888_v44 = vld [vmem:[%s2427_s5 + $0x1d8] sm:$0xff] }
  0x69   :  { %243 = vmatmul.mubr.f32.gmra.mrb[26].mxu0 %v53_v45  ;;  %v881_v45 = vld [vmem:[%s2427_s5 + $0x1a0] sm:$0xff] }
  0x6a   :  { %248 = vmatprep.mubr.f32.mxu0 %v1740_v0  ;;  %1588 = vmatpush1.bf16.msra.mxu0 %v1587_v46  ;;  %v882_v46 = vld [vmem:[%s2427_s5 + $0x1a8] sm:$0xff] }
  0x6b   :  { %1590 = vmatprep.subr.bf16.mxu0 %v1589_v47  ;;  %v2053_v58 = vpack.c.bf16 %v882_v46, %v881_v45 }
  0x6d   :  { %249 = vmatmul.mubr.f32.gmra.mrb[28].mxu0 %v54_v48 }
  0x6e   :  { %254 = vmatprep.mubr.f32.mxu0 %v1740_v0  ;;  %1592 = vmatpush1.bf16.msra.mxu0 %v1591_v55  ;;  %v417_v0 = vld [vmem:[#allocation2 + $0x3e0] sm:$0xff] }
  0x6f   :  { %v1531_v63 = vpack.c.bf16 %v417_v0, %v413_v61  ;;  %1594 = vmatprep.subr.bf16.mxu0 %v1593_v62  ;;  %v852_v0 = vld [vmem:[%s2427_s5 + $0xb8] sm:$0xff]  ;;  %v883_v62 = vld [vmem:[%s2427_s5 + $0x1b0] sm:$0xff] }
  0x70   :  { %v1609_v13 = vpack.c.bf16 %v852_v0, %v851_v57  ;;  %v858_v0 = vld [vmem:[%s2427_s5 + $0xe8] sm:$0xff] }
  0x71   :  { %255 = vmatmul.mubr.f32.gmra.mrb[30].mxu0 %v55_v49  ;;  %1532 = vmatpush1.bf16.msra.mxu1 %v1531_v63  ;;  %v1603_v49 = vpack.c.bf16 %v832_v33, %v831_v32  ;;  %v884_v63 = vld [vmem:[%s2427_s5 + $0x1b8] sm:$0xff] }
  0x72   :  { %1596 = vmatpush1.bf16.msra.mxu0 %v1595_v3  ;;  %1598 = vmatprep.subr.bf16.mxu1 %v1597_v6  ;;  %v1607_v3 = vpack.c.bf16 %v834_v51, %v833_v50  ;;  %v2078_v6 = vpack.c.bf16 %v866_v60, %v865_v59  ;;  %v2085_v18 = vpack.c.bf16 %v884_v63, %v883_v62  ;;  %v871_v59 = vld [vmem:[%s2427_s5 + $0x150] sm:$0xff]  ;;  %v872_v60 = vld [vmem:[%s2427_s5 + $0x158] sm:$0xff]  ;;  %v889_v62 = vld [vmem:[%s2427_s5 + $0x1e0] sm:$0xff] }
  0x73   :  { %1630 = vmatprep.subr.bf16.mxu0 %v1965_v9  ;;  %v890_v63 = vld [vmem:[%s2427_s5 + $0x1e8] sm:$0xff]  ;;  %v2168_v4 = vpack.c.bf16 %v872_v60, %v871_v59 }
 0x108   :  { %v166_v17 = vpop.f32.mrb[0].mxu0 }
 0x109   :  { %v167_v20 = vadd.f32 %v166_v17, %v1977_v15  ;;  %v168_v21 = vpop.f32.mrb[1].mxu0  ;;  %v853_v17 = vld [vmem:[%s2427_s5 + $0xc0] sm:$0xff] }
 0x10a   :  { %v169_v25 = vadd.f32 %v168_v21, %v1981_v16 }
 0x10b   :  { %v261_v35 = vmax.f32 %v167_v20, 0.0  ;;  %v868_v20 = vld [vmem:[%s2427_s5 + $0x138] sm:$0xff] }
 0x10c   :  { %v262_v29 = vmax.f32 %v169_v25, 0.0  ;;  %v172_v30 = vpop.f32.mrb[2].mxu0 }
 0x10d   :  { %v173_v36 = vadd.f32 %v172_v30, %v1977_v15  ;;  %v174_v37 = vpop.f32.mrb[3].mxu0  ;;  %v2110_v30 = vpack.c.bf16 %v868_v20, %v867_v19  ;;  %v2178_v19 = vpack.c.bf16 %v890_v63, %v889_v62 }
 0x10e   :  { %v175_v43 = vadd.f32 %v174_v37, %v1981_v16  ;;  %507 = vmatprep.mubr.f32.mxu1 %v262_v29  ;;  %668 = vmatprep.mubr.f32.mxu0 %v262_v29  ;;  %v838_v29 = vld [vmem:[%s2427_s5 + $0x48] sm:$0xff]  ;;  %v2117_v37 = vpack.c.bf16 %v886_v24, %v885_v23 }
 0x10f   :  { %508 = vmatmul.mubr.f32.vlgmr.msra.gmra.mrb[0].mxu1 %v261_v35  ;;  %669 = vmatmul.mubr.f32.vlgmr.msra.gmra.mrb[32].mxu0 %v261_v35  ;;  %v263_v53 = vmax.f32 %v173_v36, 0.0  ;;  %v1613_v35 = vpack.c.bf16 %v854_v22, %v853_v17  ;;  %v855_v36 = vld [vmem:[%s2427_s5 + $0xd0] sm:$0xff]  ;;  %v842_v17 = vld [vmem:[%s2427_s5 + $0x68] sm:$0xff]  ;;  %v860_v22 = vld [vmem:[%s2427_s5 + $0xf8] sm:$0xff] }
 0x110   :  { %v264_v47 = vmax.f32 %v175_v43, 0.0  ;;  %v178_v48 = vpop.f32.mrb[4].mxu0  ;;  %1600 = vmatpush3.bf16.msra.mxu1 %v1599_v31  ;;  %1632 = vmatpush3.bf16.msra.mxu0 %v2015_v34  ;;  %v887_v43 = vld [vmem:[%s2427_s5 + $0x1d0] sm:$0xff] }
 0x111   :  { %v179_v54 = vadd.f32 %v178_v48, %v1977_v15  ;;  %v180_v55 = vpop.f32.mrb[5].mxu0  ;;  %1602 = vmatprep.subr.bf16.mxu1 %v1601_v38  ;;  %1634 = vmatprep.subr.bf16.mxu0 %v2021_v40  ;;  %v869_v38 = vld [vmem:[%s2427_s5 + $0x140] sm:$0xff]  ;;  %v839_v48 = vld [vmem:[%s2427_s5 + $0x50] sm:$0xff]  ;;  %v2149_v57 = vpack.c.bf16 %v888_v44, %v887_v43 }
 0x112   :  { %v181_v61 = vadd.f32 %v180_v55, %v1981_v16  ;;  %513 = vmatprep.mubr.f32.mxu1 %v264_v47  ;;  %674 = vmatprep.mubr.f32.mxu0 %v264_v47  ;;  %v1615_v47 = vpack.c.bf16 %v838_v29, %v837_v28  ;;  %v2142_v50 = vpack.c.bf16 %v870_v39, %v869_v38 }
 0x113   :  { %514 = vmatmul.mubr.f32.gmra.mrb[2].mxu1 %v263_v53  ;;  %675 = vmatmul.mubr.f32.gmra.mrb[34].mxu0 %v263_v53  ;;  %v265_v7 = vmax.f32 %v179_v54, 0.0  ;;  %v1617_v55 = vpack.c.bf16 %v856_v42, %v855_v36 }
 0x114   :  { %v266_v1 = vmax.f32 %v181_v61, 0.0  ;;  %v184_v2 = vpop.f32.mrb[6].mxu0  ;;  %1604 = vmatpush3.bf16.msra.mxu1 %v1603_v49  ;;  %1636 = vmatpush3.bf16.msra.mxu0 %v2046_v52  ;;  %v840_v49 = vld [vmem:[%s2427_s5 + $0x58] sm:$0xff] }
 0x115   :  { %v185_v8 = vadd.f32 %v184_v2, %v1977_v15  ;;  %v186_v10 = vpop.f32.mrb[7].mxu0  ;;  %1606 = vmatprep.subr.bf16.mxu1 %v1605_v56  ;;  %1638 = vmatprep.subr.bf16.mxu0 %v2053_v58  ;;  %v857_v56 = vld [vmem:[%s2427_s5 + $0xe0] sm:$0xff] }
 0x116   :  { %v187_v21 = vadd.f32 %v186_v10, %v1981_v16  ;;  %519 = vmatprep.mubr.f32.mxu1 %v266_v1  ;;  %680 = vmatprep.mubr.f32.mxu0 %v266_v1  ;;  %v1621_v10 = vpack.c.bf16 %v858_v0, %v857_v56 }
 0x117   :  { %520 = vmatmul.mubr.f32.gmra.mrb[4].mxu1 %v265_v7  ;;  %681 = vmatmul.mubr.f32.gmra.mrb[36].mxu0 %v265_v7  ;;  %v267_v31 = vmax.f32 %v185_v8, 0.0 }
 0x118   :  { %v268_v25 = vmax.f32 %v187_v21, 0.0  ;;  %v190_v26 = vpop.f32.mrb[8].mxu0  ;;  %1608 = vmatpush3.bf16.msra.mxu1 %v1607_v3  ;;  %1640 = vmatpush3.bf16.msra.mxu0 %v2078_v6  ;;  %v1619_v3 = vpack.c.bf16 %v840_v49, %v839_v48  ;;  %v859_v21 = vld [vmem:[%s2427_s5 + $0xf0] sm:$0xff] }
 0x119   :  { %v191_v32 = vadd.f32 %v190_v26, %v1977_v15  ;;  %v192_v33 = vpop.f32.mrb[9].mxu0  ;;  %1610 = vmatprep.subr.bf16.mxu1 %v1609_v13  ;;  %1642 = vmatprep.subr.bf16.mxu0 %v2085_v18  ;;  %v841_v13 = vld [vmem:[%s2427_s5 + $0x60] sm:$0xff]  ;;  %v1625_v29 = vpack.c.bf16 %v860_v22, %v859_v21 }
 0x11a   :  { %v193_v41 = vadd.f32 %v192_v33, %v1981_v16  ;;  %525 = vmatprep.mubr.f32.mxu1 %v268_v25  ;;  %686 = vmatprep.mubr.f32.mxu0 %v268_v25  ;;  %v1623_v25 = vpack.c.bf16 %v842_v17, %v841_v13 }
 0x11b   :  { %526 = vmatmul.mubr.f32.gmra.mrb[6].mxu1 %v267_v31  ;;  %687 = vmatmul.mubr.f32.gmra.mrb[38].mxu0 %v267_v31  ;;  %v269_v51 = vmax.f32 %v191_v32, 0.0  ;;  %v843_v31 = vld [vmem:[%s2427_s5 + $0x70] sm:$0xff]  ;;  %v844_v32 = vld [vmem:[%s2427_s5 + $0x78] sm:$0xff] }
 0x11c   :  { %v270_v45 = vmax.f32 %v193_v41, 0.0  ;;  %v196_v46 = vpop.f32.mrb[10].mxu0  ;;  %1612 = vmatpush3.bf16.msra.mxu1 %v1611_v27  ;;  %1644 = vmatpush3.bf16.msra.mxu0 %v2110_v30  ;;  %v1627_v38 = vpack.c.bf16 %v844_v32, %v843_v31 }
 0x11d   :  { %v197_v53 = vadd.f32 %v196_v46, %v1977_v15  ;;  %v198_v54 = vpop.f32.mrb[11].mxu0  ;;  %1614 = vmatprep.subr.bf16.mxu1 %v1613_v35  ;;  %1646 = vmatprep.subr.bf16.mxu0 %v2117_v37 }
 0x11e   :  { %v199_v61 = vadd.f32 %v198_v54, %v1981_v16  ;;  %531 = vmatprep.mubr.f32.mxu1 %v270_v45  ;;  %692 = vmatprep.mubr.f32.mxu0 %v270_v45 }
 0x11f   :  { %532 = vmatmul.mubr.f32.gmra.mrb[8].mxu1 %v269_v51  ;;  %693 = vmatmul.mubr.f32.gmra.mrb[40].mxu0 %v269_v51  ;;  %v271_v5 = vmax.f32 %v197_v53, 0.0 }
 0x120   :  { %v272_v1 = vmax.f32 %v199_v61, 0.0  ;;  %v202_v2 = vpop.f32.mrb[12].mxu0  ;;  %1616 = vmatpush3.bf16.msra.mxu1 %v1615_v47  ;;  %1648 = vmatpush3.bf16.msra.mxu0 %v2142_v50 }
 0x121   :  { %v203_v7 = vadd.f32 %v202_v2, %v1977_v15  ;;  %v204_v8 = vpop.f32.mrb[13].mxu0  ;;  %1618 = vmatprep.subr.bf16.mxu1 %v1617_v55  ;;  %1650 = vmatprep.subr.bf16.mxu0 %v2149_v57 }
 0x122   :  { %v205_v20 = vadd.f32 %v204_v8, %v1981_v16  ;;  %537 = vmatprep.mubr.f32.mxu1 %v272_v1  ;;  %698 = vmatprep.mubr.f32.mxu0 %v272_v1 }
 0x123   :  { %538 = vmatmul.mubr.f32.gmra.mrb[10].mxu1 %v271_v5  ;;  %699 = vmatmul.mubr.f32.gmra.mrb[42].mxu0 %v271_v5  ;;  %v273_v26 = vmax.f32 %v203_v7, 0.0 }
 0x124   :  { %v274_v23 = vmax.f32 %v205_v20, 0.0  ;;  %v208_v24 = vpop.f32.mrb[14].mxu0  ;;  %1620 = vmatpush3.bf16.msra.mxu1 %v1619_v3  ;;  %1652 = vmatpush3.bf16.msra.mxu0 %v2168_v4 }
 0x125   :  { %v209_v27 = vadd.f32 %v208_v24, %v1977_v15  ;;  %v210_v28 = vpop.f32.mrb[15].mxu0  ;;  %1622 = vmatprep.subr.bf16.mxu1 %v1621_v10  ;;  %1654 = vmatprep.subr.bf16.mxu0 %v2178_v19 }
 0x126   :  { %v211_v33 = vadd.f32 %v210_v28, %v1981_v16  ;;  %543 = vmatprep.mubr.f32.mxu1 %v274_v23  ;;  %704 = vmatprep.mubr.f32.mxu0 %v274_v23 }
 0x127   :  { %544 = vmatmul.mubr.f32.gmra.mrb[12].mxu1 %v273_v26  ;;  %705 = vmatmul.mubr.f32.gmra.mrb[44].mxu0 %v273_v26  ;;  %v275_v39 = vmax.f32 %v209_v27, 0.0 }
 0x128   :  { %v276_v35 = vmax.f32 %v211_v33, 0.0  ;;  %v214_v36 = vpop.f32.mrb[16].mxu0  ;;  %1624 = vmatpush3.bf16.msra.mxu1 %v1623_v25 }
 0x129   :  { %v215_v41 = vadd.f32 %v214_v36, %v1977_v15  ;;  %v216_v42 = vpop.f32.mrb[17].mxu0  ;;  %1626 = vmatprep.subr.bf16.mxu1 %v1625_v29 }
 0x12a   :  { %v217_v43 = vadd.f32 %v216_v42, %v1981_v16  ;;  %549 = vmatprep.mubr.f32.mxu1 %v276_v35  ;;  %710 = vmatprep.mubr.f32.mxu0 %v276_v35 }
 0x12b   :  { %550 = vmatmul.mubr.f32.gmra.mrb[14].mxu1 %v275_v39  ;;  %711 = vmatmul.mubr.f32.gmra.mrb[46].mxu0 %v275_v39  ;;  %v277_v46 = vmax.f32 %v215_v41, 0.0  ;;  %v873_v41 = vld [vmem:[%s2427_s5 + $0x160] sm:$0xff] }
 0x12c   :  { %v278_v44 = vmax.f32 %v217_v43, 0.0  ;;  %v220_v45 = vpop.f32.mrb[18].mxu0  ;;  %1628 = vmatpush3.bf16.msra.mxu1 %v1627_v38  ;;  %v892_v43 = vld [vmem:[%s2427_s5 + $0x1f8] sm:$0xff] }
 0x12d   :  { %v221_v47 = vadd.f32 %v220_v45, %v1977_v15  ;;  %v222_v48 = vpop.f32.mrb[19].mxu0  ;;  %1661 = vmatprep.subr.bf16.mxu1 %v1965_v9  ;;  %v875_v45 = vld [vmem:[%s2427_s5 + $0x170] sm:$0xff] }
 0x12e   :  { %v223_v49 = vadd.f32 %v222_v48, %v1981_v16  ;;  %555 = vmatprep.mubr.f32.mxu1 %v278_v44  ;;  %716 = vmatprep.mubr.f32.mxu0 %v278_v44  ;;  %v433_v48 = vsub.s32 2, %v1968_v11 }
 0x12f   :  { %556 = vmatmul.mubr.f32.gmra.mrb[16].mxu1 %v277_v46  ;;  %717 = vmatmul.mubr.f32.gmra.mrb[48].mxu0 %v277_v46  ;;  %v279_v54 = vmax.f32 %v221_v47, 0.0  ;;  %v876_v46 = vld [vmem:[%s2427_s5 + $0x178] sm:$0xff] }
 0x130   :  { %v280_v51 = vmax.f32 %v223_v49, 0.0  ;;  %v226_v53 = vpop.f32.mrb[20].mxu0  ;;  %v2237_v47 = vpack.c.bf16 %v876_v46, %v875_v45  ;;  %v421_v49 = vld [vmem:[%s2426_s4] sm:$0xf] }
 0x131   :  { %v227_v55 = vadd.f32 %v226_v53, %v1977_v15  ;;  %v228_v56 = vpop.f32.mrb[21].mxu0  ;;  %v2248_v53 = vrot.slane %v421_v49, %v92_v12 }
 0x132   :  { %v229_v59 = vadd.f32 %v228_v56, %v1981_v16  ;;  %561 = vmatprep.mubr.f32.mxu1 %v280_v51  ;;  %722 = vmatprep.mubr.f32.mxu0 %v280_v51  ;;  %v437_v51 = vsub.s32 3, %v1968_v11 }
 0x133   :  { %562 = vmatmul.mubr.f32.gmra.mrb[18].mxu1 %v279_v54  ;;  %723 = vmatmul.mubr.f32.gmra.mrb[50].mxu0 %v279_v54  ;;  %v281_v61 = vmax.f32 %v227_v55, 0.0  ;;  %v2250_v54 = vrot.slane %v421_v49, %v433_v48  ;;  %v2254_v55 = vrot.slane %v421_v49, %v96_v14 }
 0x134   :  { %v282_v60 = vmax.f32 %v229_v59, 0.0  ;;  %v232_v9 = vpop.f32.mrb[22].mxu0  ;;  %v2256_v56 = vrot.slane %v421_v49, %v437_v51 }
 0x135   :  { %v233_v0 = vadd.f32 %v232_v9, %v1977_v15  ;;  %v234_v62 = vpop.f32.mrb[23].mxu0 }
 0x136   :  { %v235_v63 = vadd.f32 %v234_v62, %v1981_v16  ;;  %567 = vmatprep.mubr.f32.mxu1 %v282_v60  ;;  %728 = vmatprep.mubr.f32.mxu0 %v282_v60 }
 0x137   :  { %568 = vmatmul.mubr.f32.gmra.mrb[20].mxu1 %v281_v61  ;;  %729 = vmatmul.mubr.f32.gmra.mrb[52].mxu0 %v281_v61  ;;  %v283_v3 = vmax.f32 %v233_v0, 0.0 }
 0x138   :  { %v284_v1 = vmax.f32 %v235_v63, 0.0  ;;  %v238_v2 = vpop.f32.mrb[24].mxu0 }
 0x139   :  { %v239_v5 = vadd.f32 %v238_v2, %v1977_v15  ;;  %v240_v7 = vpop.f32.mrb[25].mxu0 }
 0x13a   :  { %v241_v8 = vadd.f32 %v240_v7, %v1981_v16  ;;  %573 = vmatprep.mubr.f32.mxu1 %v284_v1  ;;  %734 = vmatprep.mubr.f32.mxu0 %v284_v1 }
 0x13b   :  { %574 = vmatmul.mubr.f32.gmra.mrb[22].mxu1 %v283_v3  ;;  %735 = vmatmul.mubr.f32.gmra.mrb[54].mxu0 %v283_v3  ;;  %v285_v17 = vmax.f32 %v239_v5, 0.0 }
 0x13c   :  { %v286_v10 = vmax.f32 %v241_v8, 0.0  ;;  %v244_v13 = vpop.f32.mrb[26].mxu0 }
 0x13d   :  { %v245_v20 = vadd.f32 %v244_v13, %v1977_v15  ;;  %v246_v21 = vpop.f32.mrb[27].mxu0 }
 0x13e   :  { %v247_v22 = vadd.f32 %v246_v21, %v1981_v16  ;;  %579 = vmatprep.mubr.f32.mxu1 %v286_v10  ;;  %740 = vmatprep.mubr.f32.mxu0 %v286_v10 }
 0x13f   :  { %580 = vmatmul.mubr.f32.gmra.mrb[24].mxu1 %v285_v17  ;;  %741 = vmatmul.mubr.f32.gmra.mrb[56].mxu0 %v285_v17  ;;  %v287_v25 = vmax.f32 %v245_v20, 0.0 }
 0x140   :  { %v288_v23 = vmax.f32 %v247_v22, 0.0  ;;  %v250_v24 = vpop.f32.mrb[28].mxu0 }
 0x141   :  { %v251_v26 = vadd.f32 %v250_v24, %v1977_v15  ;;  %v252_v27 = vpop.f32.mrb[29].mxu0 }
 0x142   :  { %v253_v28 = vadd.f32 %v252_v27, %v1981_v16  ;;  %585 = vmatprep.mubr.f32.mxu1 %v288_v23  ;;  %746 = vmatprep.mubr.f32.mxu0 %v288_v23 }
 0x143   :  { %586 = vmatmul.mubr.f32.gmra.mrb[26].mxu1 %v287_v25  ;;  %747 = vmatmul.mubr.f32.gmra.mrb[58].mxu0 %v287_v25  ;;  %v289_v32 = vmax.f32 %v251_v26, 0.0 }
 0x144   :  { %v290_v29 = vmax.f32 %v253_v28, 0.0  ;;  %v256_v31 = vpop.f32.mrb[30].mxu0 }
 0x145   :  { %v257_v33 = vadd.f32 %v256_v31, %v1977_v15  ;;  %v258_v35 = vpop.f32.mrb[31].mxu0  ;;  %v874_v15 = vld [vmem:[%s2427_s5 + $0x168] sm:$0xff] }
 0x146   :  { %v259_v36 = vadd.f32 %v258_v35, %v1981_v16  ;;  %591 = vmatprep.mubr.f32.mxu1 %v290_v29  ;;  %752 = vmatprep.mubr.f32.mxu0 %v290_v29  ;;  %v2220_v42 = vpack.c.bf16 %v874_v15, %v873_v41  ;;  %v891_v16 = vld [vmem:[%s2427_s5 + $0x1f0] sm:$0xff] }
 0x147   :  { %592 = vmatmul.mubr.f32.gmra.mrb[28].mxu1 %v289_v32  ;;  %753 = vmatmul.mubr.f32.gmra.mrb[60].mxu0 %v289_v32  ;;  %v291_v39 = vmax.f32 %v257_v33, 0.0  ;;  %v2229_v44 = vpack.c.bf16 %v892_v43, %v891_v16 }
 0x148   :  { %v292_v38 = vmax.f32 %v259_v36, 0.0  ;;  %1656 = vmatpush3.bf16.msra.mxu0 %v2220_v42 }
 0x149   :  { %1658 = vmatprep.subr.bf16.mxu0 %v2229_v44 }
 0x14a   :  { %597 = vmatprep.mubr.f32.mxu1 %v292_v38  ;;  %758 = vmatprep.mubr.f32.mxu0 %v292_v38 }
 0x14b   :  { %598 = vmatmul.mubr.f32.gmra.mrb[30].mxu1 %v291_v39  ;;  %759 = vmatmul.mubr.f32.gmra.mrb[62].mxu0 %v291_v39 }
 0x14c   :  { %1660 = vmatpush3.bf16.msra.mxu0 %v2237_v47 }
 0x1e2   :  { %v509_v59 = vpop.f32.mrb[0].mxu1  ;;  %v670_v60 = vpop.f32.mrb[32].mxu0 }
 0x1e3   :  { %v510_v9 = vadd.f32 %v509_v59, %v2248_v53  ;;  %v671_v61 = vadd.f32 %v670_v60, %v2250_v54  ;;  %v511_v0 = vpop.f32.mrb[1].mxu1  ;;  %v672_v62 = vpop.f32.mrb[33].mxu0 }
 0x1e4   :  { %v512_v63 = vadd.f32 %v511_v0, %v2254_v55  ;;  %v673_v12 = vadd.f32 %v672_v62, %v2256_v56 }
 0x1e5   :  { %v765_v14 = vmax.f32 %v510_v9, 0.0  ;;  %v767_v5 = vmax.f32 %v671_v61, 0.0 }
 0x1e6   :  { %v766_v1 = vmax.f32 %v512_v63, 0.0  ;;  %v768_v2 = vmax.f32 %v673_v12, 0.0  ;;  %v515_v3 = vpop.f32.mrb[2].mxu1  ;;  %v676_v11 = vpop.f32.mrb[34].mxu0 }
 0x1e7   :  { %v516_v7 = vadd.f32 %v515_v3, %v2248_v53  ;;  %v677_v8 = vadd.f32 %v676_v11, %v2250_v54  ;;  %v517_v10 = vpop.f32.mrb[3].mxu1  ;;  %v678_v13 = vpop.f32.mrb[35].mxu0 }
 0x1e8   :  { %v518_v17 = vadd.f32 %v517_v10, %v2254_v55  ;;  %v679_v20 = vadd.f32 %v678_v13, %v2256_v56  ;;  %964 = vmatprep.mubr.f32.mxu1 %v766_v1  ;;  %1109 = vmatprep.mubr.f32.mxu0 %v768_v2 }
 0x1e9   :  { %965 = vmatmul.mubr.f32.vlgmr.msra.gmra.mrb[32].mxu1 %v765_v14  ;;  %1110 = vmatmul.mubr.f32.vlgmr.msra.gmra.mrb[64].mxu0 %v767_v5  ;;  %v769_v25 = vmax.f32 %v516_v7, 0.0  ;;  %v771_v26 = vmax.f32 %v677_v8, 0.0 }
 0x1ea   :  { %v770_v21 = vmax.f32 %v518_v17, 0.0  ;;  %v772_v22 = vmax.f32 %v679_v20, 0.0  ;;  %1669 = vmatpush3.bf16.msra.mxu1 %v2015_v34  ;;  %v521_v23 = vpop.f32.mrb[4].mxu1  ;;  %v682_v24 = vpop.f32.mrb[36].mxu0 }
 0x1eb   :  { %v522_v27 = vadd.f32 %v521_v23, %v2248_v53  ;;  %v683_v28 = vadd.f32 %v682_v24, %v2250_v54  ;;  %v523_v29 = vpop.f32.mrb[5].mxu1  ;;  %v684_v31 = vpop.f32.mrb[37].mxu0  ;;  %1662 = vmatprep.subr.bf16.mxu1 %v2021_v40 }
 0x1ec   :  { %v524_v32 = vadd.f32 %v523_v29, %v2254_v55  ;;  %v685_v33 = vadd.f32 %v684_v31, %v2256_v56  ;;  %969 = vmatprep.mubr.f32.mxu1 %v770_v21  ;;  %1114 = vmatprep.mubr.f32.mxu0 %v772_v22 }
 0x1ed   :  { %970 = vmatmul.mubr.f32.gmra.mrb[34].mxu1 %v769_v25  ;;  %1115 = vmatmul.mubr.f32.gmra.mrb[66].mxu0 %v771_v26  ;;  %v773_v39 = vmax.f32 %v522_v27, 0.0  ;;  %v775_v41 = vmax.f32 %v683_v28, 0.0 }
 0x1ee   :  { %v774_v34 = vmax.f32 %v524_v32, 0.0  ;;  %v776_v35 = vmax.f32 %v685_v33, 0.0  ;;  %v527_v36 = vpop.f32.mrb[6].mxu1  ;;  %v688_v38 = vpop.f32.mrb[38].mxu0  ;;  %1670 = vmatpush3.bf16.msra.mxu1 %v2046_v52 }
 0x1ef   :  { %v528_v15 = vadd.f32 %v527_v36, %v2248_v53  ;;  %v689_v40 = vadd.f32 %v688_v38, %v2250_v54  ;;  %v529_v16 = vpop.f32.mrb[7].mxu1  ;;  %v690_v43 = vpop.f32.mrb[39].mxu0  ;;  %1663 = vmatprep.subr.bf16.mxu1 %v2053_v58 }
 0x1f0   :  { %v530_v45 = vadd.f32 %v529_v16, %v2254_v55  ;;  %v691_v46 = vadd.f32 %v690_v43, %v2256_v56  ;;  %974 = vmatprep.mubr.f32.mxu1 %v774_v34  ;;  %1119 = vmatprep.mubr.f32.mxu0 %v776_v35 }
 0x1f1   :  { %975 = vmatmul.mubr.f32.gmra.mrb[36].mxu1 %v773_v39  ;;  %1120 = vmatmul.mubr.f32.gmra.mrb[68].mxu0 %v775_v41  ;;  %v777_v59 = vmax.f32 %v528_v15, 0.0  ;;  %v779_v60 = vmax.f32 %v689_v40, 0.0 }
 0x1f2   :  { %v778_v48 = vmax.f32 %v530_v45, 0.0  ;;  %v780_v52 = vmax.f32 %v691_v46, 0.0  ;;  %v533_v49 = vpop.f32.mrb[8].mxu1  ;;  %v694_v51 = vpop.f32.mrb[40].mxu0  ;;  %1671 = vmatpush3.bf16.msra.mxu1 %v2078_v6 }
 0x1f3   :  { %v534_v9 = vadd.f32 %v533_v49, %v2248_v53  ;;  %v695_v58 = vadd.f32 %v694_v51, %v2250_v54  ;;  %v535_v61 = vpop.f32.mrb[9].mxu1  ;;  %v696_v0 = vpop.f32.mrb[41].mxu0  ;;  %1664 = vmatprep.subr.bf16.mxu1 %v2085_v18 }
 0x1f4   :  { %v536_v62 = vadd.f32 %v535_v61, %v2254_v55  ;;  %v697_v63 = vadd.f32 %v696_v0, %v2256_v56  ;;  %979 = vmatprep.mubr.f32.mxu1 %v778_v48  ;;  %1124 = vmatprep.mubr.f32.mxu0 %v780_v52 }
 0x1f5   :  { %980 = vmatmul.mubr.f32.gmra.mrb[38].mxu1 %v777_v59  ;;  %1125 = vmatmul.mubr.f32.gmra.mrb[70].mxu0 %v779_v60  ;;  %v781_v3 = vmax.f32 %v534_v9, 0.0  ;;  %v783_v11 = vmax.f32 %v695_v58, 0.0 }
 0x1f6   :  { %v782_v12 = vmax.f32 %v536_v62, 0.0  ;;  %v784_v6 = vmax.f32 %v697_v63, 0.0  ;;  %v539_v1 = vpop.f32.mrb[10].mxu1  ;;  %v700_v2 = vpop.f32.mrb[42].mxu0  ;;  %1672 = vmatpush3.bf16.msra.mxu1 %v2110_v30 }
 0x1f7   :  { %v540_v14 = vadd.f32 %v539_v1, %v2248_v53  ;;  %v701_v18 = vadd.f32 %v700_v2, %v2250_v54  ;;  %v541_v5 = vpop.f32.mrb[11].mxu1  ;;  %v702_v7 = vpop.f32.mrb[43].mxu0  ;;  %1665 = vmatprep.subr.bf16.mxu1 %v2117_v37 }
 0x1f8   :  { %v542_v8 = vadd.f32 %v541_v5, %v2254_v55  ;;  %v703_v10 = vadd.f32 %v702_v7, %v2256_v56  ;;  %984 = vmatprep.mubr.f32.mxu1 %v782_v12  ;;  %1129 = vmatprep.mubr.f32.mxu0 %v784_v6 }
 0x1f9   :  { %985 = vmatmul.mubr.f32.gmra.mrb[40].mxu1 %v781_v3  ;;  %1130 = vmatmul.mubr.f32.gmra.mrb[72].mxu0 %v783_v11  ;;  %v785_v21 = vmax.f32 %v540_v14, 0.0  ;;  %v787_v22 = vmax.f32 %v701_v18, 0.0 }
 0x1fa   :  { %v786_v13 = vmax.f32 %v542_v8, 0.0  ;;  %v788_v30 = vmax.f32 %v703_v10, 0.0  ;;  %v545_v17 = vpop.f32.mrb[12].mxu1  ;;  %v706_v20 = vpop.f32.mrb[44].mxu0  ;;  %1673 = vmatpush3.bf16.msra.mxu1 %v2142_v50 }
 0x1fb   :  { %v546_v23 = vadd.f32 %v545_v17, %v2248_v53  ;;  %v707_v37 = vadd.f32 %v706_v20, %v2250_v54  ;;  %v547_v24 = vpop.f32.mrb[13].mxu1  ;;  %v708_v25 = vpop.f32.mrb[45].mxu0  ;;  %1666 = vmatprep.subr.bf16.mxu1 %v2149_v57 }
 0x1fc   :  { %v548_v26 = vadd.f32 %v547_v24, %v2254_v55  ;;  %v709_v27 = vadd.f32 %v708_v25, %v2256_v56  ;;  %989 = vmatprep.mubr.f32.mxu1 %v786_v13  ;;  %1134 = vmatprep.mubr.f32.mxu0 %v788_v30 }
 0x1fd   :  { %990 = vmatmul.mubr.f32.gmra.mrb[42].mxu1 %v785_v21  ;;  %1135 = vmatmul.mubr.f32.gmra.mrb[74].mxu0 %v787_v22  ;;  %v789_v32 = vmax.f32 %v546_v23, 0.0  ;;  %v791_v33 = vmax.f32 %v707_v37, 0.0 }
 0x1fe   :  { %v790_v28 = vmax.f32 %v548_v26, 0.0  ;;  %v792_v50 = vmax.f32 %v709_v27, 0.0  ;;  %v551_v29 = vpop.f32.mrb[14].mxu1  ;;  %v712_v31 = vpop.f32.mrb[46].mxu0  ;;  %1674 = vmatpush3.bf16.msra.mxu1 %v2168_v4 }
 0x1ff   :  { %v552_v34 = vadd.f32 %v551_v29, %v2248_v53  ;;  %v713_v57 = vadd.f32 %v712_v31, %v2250_v54  ;;  %v553_v35 = vpop.f32.mrb[15].mxu1  ;;  %v714_v36 = vpop.f32.mrb[47].mxu0  ;;  %1667 = vmatprep.subr.bf16.mxu1 %v2178_v19 }
 0x200   :  { %v554_v38 = vadd.f32 %v553_v35, %v2254_v55  ;;  %v715_v39 = vadd.f32 %v714_v36, %v2256_v56  ;;  %994 = vmatprep.mubr.f32.mxu1 %v790_v28  ;;  %1139 = vmatprep.mubr.f32.mxu0 %v792_v50 }
 0x201   :  { %995 = vmatmul.mubr.f32.gmra.mrb[44].mxu1 %v789_v32  ;;  %1140 = vmatmul.mubr.f32.gmra.mrb[76].mxu0 %v791_v33  ;;  %v793_v16 = vmax.f32 %v552_v34, 0.0  ;;  %v795_v43 = vmax.f32 %v713_v57, 0.0 }
 0x202   :  { %v794_v41 = vmax.f32 %v554_v38, 0.0  ;;  %v796_v4 = vmax.f32 %v715_v39, 0.0  ;;  %v557_v15 = vpop.f32.mrb[16].mxu1  ;;  %v718_v40 = vpop.f32.mrb[48].mxu0  ;;  %1675 = vmatpush3.bf16.msra.mxu1 %v2220_v42 }
 0x203   :  { %v558_v45 = vadd.f32 %v557_v15, %v2248_v53  ;;  %v719_v19 = vadd.f32 %v718_v40, %v2250_v54  ;;  %v559_v46 = vpop.f32.mrb[17].mxu1  ;;  %v720_v48 = vpop.f32.mrb[49].mxu0  ;;  %1668 = vmatprep.subr.bf16.mxu1 %v2229_v44 }
 0x204   :  { %v560_v52 = vadd.f32 %v559_v46, %v2254_v55  ;;  %v721_v49 = vadd.f32 %v720_v48, %v2256_v56  ;;  %999 = vmatprep.mubr.f32.mxu1 %v794_v41  ;;  %1144 = vmatprep.mubr.f32.mxu0 %v796_v4 }
 0x205   :  { %1000 = vmatmul.mubr.f32.gmra.mrb[46].mxu1 %v793_v16  ;;  %1145 = vmatmul.mubr.f32.gmra.mrb[78].mxu0 %v795_v43  ;;  %v797_v9 = vmax.f32 %v558_v45, 0.0  ;;  %v799_v58 = vmax.f32 %v719_v19, 0.0 }
 0x206   :  { %v798_v51 = vmax.f32 %v560_v52, 0.0  ;;  %v800_v42 = vmax.f32 %v721_v49, 0.0  ;;  %v563_v59 = vpop.f32.mrb[18].mxu1  ;;  %v724_v60 = vpop.f32.mrb[50].mxu0  ;;  %1676 = vmatpush3.bf16.msra.mxu1 %v2237_v47 }
 0x207   :  { %v564_v61 = vadd.f32 %v563_v59, %v2248_v53  ;;  %v725_v44 = vadd.f32 %v724_v60, %v2250_v54  ;;  %v565_v0 = vpop.f32.mrb[19].mxu1  ;;  %v726_v62 = vpop.f32.mrb[51].mxu0 }
 0x208   :  { %v566_v63 = vadd.f32 %v565_v0, %v2254_v55  ;;  %v727_v12 = vadd.f32 %v726_v62, %v2256_v56  ;;  %1004 = vmatprep.mubr.f32.mxu1 %v798_v51  ;;  %1149 = vmatprep.mubr.f32.mxu0 %v800_v42 }
 0x209   :  { %1005 = vmatmul.mubr.f32.gmra.mrb[48].mxu1 %v797_v9  ;;  %1150 = vmatmul.mubr.f32.gmra.mrb[80].mxu0 %v799_v58  ;;  %v801_v3 = vmax.f32 %v564_v61, 0.0  ;;  %v803_v11 = vmax.f32 %v725_v44, 0.0 }
 0x20a   :  { %v802_v6 = vmax.f32 %v566_v63, 0.0  ;;  %v804_v1 = vmax.f32 %v727_v12, 0.0  ;;  %v569_v2 = vpop.f32.mrb[20].mxu1  ;;  %v730_v47 = vpop.f32.mrb[52].mxu0 }
 0x20b   :  { %v570_v14 = vadd.f32 %v569_v2, %v2248_v53  ;;  %v731_v18 = vadd.f32 %v730_v47, %v2250_v54  ;;  %v571_v5 = vpop.f32.mrb[21].mxu1  ;;  %v732_v7 = vpop.f32.mrb[53].mxu0 }
 0x20c   :  { %v572_v8 = vadd.f32 %v571_v5, %v2254_v55  ;;  %v733_v10 = vadd.f32 %v732_v7, %v2256_v56  ;;  %1009 = vmatprep.mubr.f32.mxu1 %v802_v6  ;;  %1154 = vmatprep.mubr.f32.mxu0 %v804_v1 }
 0x20d   :  { %1010 = vmatmul.mubr.f32.gmra.mrb[50].mxu1 %v801_v3  ;;  %1155 = vmatmul.mubr.f32.gmra.mrb[82].mxu0 %v803_v11  ;;  %v805_v21 = vmax.f32 %v570_v14, 0.0  ;;  %v807_v22 = vmax.f32 %v731_v18, 0.0 }
 0x20e   :  { %v806_v13 = vmax.f32 %v572_v8, 0.0  ;;  %v808_v30 = vmax.f32 %v733_v10, 0.0  ;;  %v575_v17 = vpop.f32.mrb[22].mxu1  ;;  %v736_v20 = vpop.f32.mrb[54].mxu0 }
 0x20f   :  { %v576_v23 = vadd.f32 %v575_v17, %v2248_v53  ;;  %v737_v37 = vadd.f32 %v736_v20, %v2250_v54  ;;  %v577_v24 = vpop.f32.mrb[23].mxu1  ;;  %v738_v25 = vpop.f32.mrb[55].mxu0  ;;  %v2340_v17 = vld [vmem:[%s2428_s6] ss:$0 sm:$0xff] }
 0x210   :  { %v578_v26 = vadd.f32 %v577_v24, %v2254_v55  ;;  %v739_v27 = vadd.f32 %v738_v25, %v2256_v56  ;;  %1014 = vmatprep.mubr.f32.mxu1 %v806_v13  ;;  %1159 = vmatprep.mubr.f32.mxu0 %v808_v30 }
 0x211   :  { %1015 = vmatmul.mubr.f32.gmra.mrb[52].mxu1 %v805_v21  ;;  %1160 = vmatmul.mubr.f32.gmra.mrb[84].mxu0 %v807_v22  ;;  %v809_v32 = vmax.f32 %v576_v23, 0.0  ;;  %v811_v33 = vmax.f32 %v737_v37, 0.0 }
 0x212   :  { %v810_v28 = vmax.f32 %v578_v26, 0.0  ;;  %v812_v50 = vmax.f32 %v739_v27, 0.0  ;;  %v581_v29 = vpop.f32.mrb[24].mxu1  ;;  %v742_v31 = vpop.f32.mrb[56].mxu0 }
 0x213   :  { %v582_v34 = vadd.f32 %v581_v29, %v2248_v53  ;;  %v743_v57 = vadd.f32 %v742_v31, %v2250_v54  ;;  %v583_v35 = vpop.f32.mrb[25].mxu1  ;;  %v744_v36 = vpop.f32.mrb[57].mxu0 }
 0x214   :  { %v584_v38 = vadd.f32 %v583_v35, %v2254_v55  ;;  %1019 = vmatprep.mubr.f32.mxu1 %v810_v28  ;;  %1164 = vmatprep.mubr.f32.mxu0 %v812_v50  ;;  %v745_v47 = vadd.f32 %v744_v36, %v2256_v56 }
 0x215   :  { %1020 = vmatmul.mubr.f32.gmra.mrb[54].mxu1 %v809_v32  ;;  %1165 = vmatmul.mubr.f32.gmra.mrb[86].mxu0 %v811_v33  ;;  %v813_v15 = vmax.f32 %v582_v34, 0.0  ;;  %v815_v7 = vmax.f32 %v743_v57, 0.0 }
 0x216   :  { %v814_v39 = vmax.f32 %v584_v38, 0.0  ;;  %v587_v41 = vpop.f32.mrb[26].mxu1  ;;  %v748_v4 = vpop.f32.mrb[58].mxu0  ;;  %v816_v5 = vmax.f32 %v745_v47, 0.0 }
 0x217   :  { %v588_v40 = vadd.f32 %v587_v41, %v2248_v53  ;;  %v749_v16 = vadd.f32 %v748_v4, %v2250_v54  ;;  %v589_v43 = vpop.f32.mrb[27].mxu1  ;;  %v750_v45 = vpop.f32.mrb[59].mxu0 }
 0x218   :  { %v590_v19 = vadd.f32 %v589_v43, %v2254_v55  ;;  %v751_v46 = vadd.f32 %v750_v45, %v2256_v56  ;;  %1024 = vmatprep.mubr.f32.mxu1 %v814_v39 }
 0x219   :  { %1025 = vmatmul.mubr.f32.gmra.mrb[56].mxu1 %v813_v15  ;;  %v817_v51 = vmax.f32 %v588_v40, 0.0 }
 0x21a   :  { %v818_v48 = vmax.f32 %v590_v19, 0.0  ;;  %v593_v52 = vpop.f32.mrb[28].mxu1  ;;  %v754_v49 = vpop.f32.mrb[60].mxu0 }
 0x21b   :  { %v594_v42 = vadd.f32 %v593_v52, %v2248_v53  ;;  %v755_v59 = vadd.f32 %v754_v49, %v2250_v54  ;;  %v595_v60 = vpop.f32.mrb[29].mxu1  ;;  %v756_v9 = vpop.f32.mrb[61].mxu0 }
 0x21c   :  { %v596_v58 = vadd.f32 %v595_v60, %v2254_v55  ;;  %v757_v61 = vadd.f32 %v756_v9, %v2256_v56  ;;  %1029 = vmatprep.mubr.f32.mxu1 %v818_v48 }
 0x21d   :  { %1030 = vmatmul.mubr.f32.gmra.mrb[58].mxu1 %v817_v51  ;;  %v821_v63 = vmax.f32 %v594_v42, 0.0  ;;  %v823_v10 = vmax.f32 %v755_v59, 0.0 }
 0x21e   :  { %v822_v44 = vmax.f32 %v596_v58, 0.0  ;;  %v599_v0 = vpop.f32.mrb[30].mxu1  ;;  %v760_v62 = vpop.f32.mrb[62].mxu0  ;;  %v824_v8 = vmax.f32 %v757_v61, 0.0 }
 0x21f   :  { %v600_v12 = vadd.f32 %v599_v0, %v2248_v53  ;;  %v761_v6 = vadd.f32 %v760_v62, %v2250_v54  ;;  %v601_v1 = vpop.f32.mrb[31].mxu1  ;;  %v762_v2 = vpop.f32.mrb[63].mxu0  ;;  %v820_v53 = vmax.f32 %v751_v46, 0.0  ;;  %v819_v54 = vmax.f32 %v749_v16, 0.0 }
 0x220   :  { %v602_v3 = vadd.f32 %v601_v1, %v2254_v55  ;;  %v763_v11 = vadd.f32 %v762_v2, %v2256_v56  ;;  %1034 = vmatprep.mubr.f32.mxu1 %v822_v44 }
 0x221   :  { %1035 = vmatmul.mubr.f32.gmra.mrb[60].mxu1 %v821_v63  ;;  %v825_v18 = vmax.f32 %v600_v12, 0.0  ;;  %v827_v56 = vmax.f32 %v761_v6, 0.0 }
 0x222   :  { %v826_v14 = vmax.f32 %v602_v3, 0.0  ;;  %v828_v55 = vmax.f32 %v763_v11, 0.0 }
 0x224   :  { %1039 = vmatprep.mubr.f32.mxu1 %v826_v14 }
 0x225   :  { %1040 = vmatmul.mubr.f32.gmra.mrb[62].mxu1 %v825_v18 }
 0x226   :  { %1169 = vmatprep.mubr.f32.mxu1 %v816_v5 }
 0x229   :  { %1170 = vmatmul.mubr.f32.vlgmr.msra.gmra.mrb[64].mxu1 %v815_v7 }
 0x22a   :  { %1174 = vmatprep.mubr.f32.mxu1 %v820_v53 }
 0x22d   :  { %1175 = vmatmul.mubr.f32.gmra.mrb[66].mxu1 %v819_v54 }
 0x22e   :  { %1179 = vmatprep.mubr.f32.mxu1 %v824_v8 }
 0x231   :  { %1180 = vmatmul.mubr.f32.gmra.mrb[68].mxu1 %v823_v10 }
 0x232   :  { %1184 = vmatprep.mubr.f32.mxu1 %v828_v55 }
 0x235   :  { %1185 = vmatmul.mubr.f32.gmra.mrb[70].mxu1 %v827_v56 }
 0x2bc   :  { %v1309_v13 = vpop.f32.mrb[32].mxu1  ;;  %v1389_v30 = vpop.f32.mrb[64].mxu0 }
 0x2bd   :  { %v1310_v20 = vpop.f32.mrb[33].mxu1  ;;  %v1390_v21 = vpop.f32.mrb[65].mxu0 }
 0x2be   :  { %v1311_v22 = vadd.f32 %v1310_v20, %v1309_v13  ;;  %v1391_v23 = vadd.f32 %v1390_v21, %v1389_v30 }
 0x2c0   :  { %v967_v37 = vadd.f32 %v1311_v22, %v2340_v17  ;;  %v1312_v24 = vpop.f32.mrb[34].mxu1  ;;  %v1392_v25 = vpop.f32.mrb[66].mxu0 }
 0x2c1   :  { %v1313_v26 = vpop.f32.mrb[35].mxu1  ;;  %v1393_v27 = vpop.f32.mrb[67].mxu0 }
 0x2c2   :  { %v1112_v28 = vadd.f32 %v1391_v23, %v967_v37  ;;  %v1314_v50 = vadd.f32 %v1313_v26, %v1312_v24  ;;  %v1394_v29 = vadd.f32 %v1393_v27, %v1392_v25 }
 0x2c4   :  { %v1190_v31 = vmul.f32 0.5, %v1112_v28  ;;  %v972_v32 = vadd.f32 %v1314_v50, %v2340_v17  ;;  %v1315_v33 = vpop.f32.mrb[36].mxu1  ;;  %v1395_v34 = vpop.f32.mrb[68].mxu0 }
 0x2c5   :  { %v1316_v57 = vpop.f32.mrb[37].mxu1  ;;  %v1396_v35 = vpop.f32.mrb[69].mxu0 }
 0x2c6   :  { %1681 = vtanh.f32 %v1190_v31  ;;  %v1117_v36 = vadd.f32 %v1394_v29, %v972_v32  ;;  %v1317_v38 = vadd.f32 %v1316_v57, %v1315_v33  ;;  %v1397_v39 = vadd.f32 %v1396_v35, %v1395_v34 }
 0x2c8   :  { %v1191_v41 = vmul.f32 0.5, %v1117_v36  ;;  %v977_v4 = vadd.f32 %v1317_v38, %v2340_v17  ;;  %v1318_v15 = vpop.f32.mrb[38].mxu1  ;;  %v1398_v40 = vpop.f32.mrb[70].mxu0 }
 0x2c9   :  { %v1319_v16 = vpop.f32.mrb[39].mxu1  ;;  %v1399_v43 = vpop.f32.mrb[71].mxu0 }
 0x2ca   :  { %1683 = vtanh.f32 %v1191_v41  ;;  %v1122_v45 = vadd.f32 %v1397_v39, %v977_v4  ;;  %v1320_v19 = vadd.f32 %v1319_v16, %v1318_v15  ;;  %v1400_v46 = vadd.f32 %v1399_v43, %v1398_v40 }
 0x2cc   :  { %v1192_v48 = vmul.f32 0.5, %v1122_v45  ;;  %v982_v52 = vadd.f32 %v1320_v19, %v2340_v17  ;;  %v1321_v49 = vpop.f32.mrb[40].mxu1  ;;  %v1401_v51 = vpop.f32.mrb[72].mxu0 }
 0x2cd   :  { %v1322_v42 = vpop.f32.mrb[41].mxu1  ;;  %v1402_v59 = vpop.f32.mrb[73].mxu0 }
 0x2ce   :  { %1685 = vtanh.f32 %v1192_v48  ;;  %v1127_v60 = vadd.f32 %v1400_v46, %v982_v52  ;;  %v1323_v9 = vadd.f32 %v1322_v42, %v1321_v49  ;;  %v1403_v58 = vadd.f32 %v1402_v59, %v1401_v51 }
 0x2d0   :  { %v1682_v61 = vpop.eup %1681  ;;  %v1193_v44 = vmul.f32 0.5, %v1127_v60  ;;  %v987_v0 = vadd.f32 %v1323_v9, %v2340_v17  ;;  %v1324_v62 = vpop.f32.mrb[42].mxu1 }
 0x2d1   :  { %v1404_v63 = vpop.f32.mrb[74].mxu0  ;;  %v1222_v12 = vadd.f32 1.0, %v1682_v61  ;;  %v1325_v6 = vpop.f32.mrb[43].mxu1 }
 0x2d2   :  { %v1405_v1 = vpop.f32.mrb[75].mxu0  ;;  %1687 = vtanh.f32 %v1193_v44  ;;  %v1132_v2 = vadd.f32 %v1403_v58, %v987_v0  ;;  %v1326_v47 = vadd.f32 %v1325_v6, %v1324_v62 }
 0x2d3   :  { %v1406_v3 = vadd.f32 %v1405_v1, %v1404_v63  ;;  %v1238_v11 = vmul.f32 0.5, %v1222_v12 }
 0x2d4   :  { %v1684_v14 = vpop.eup %1683  ;;  %v1194_v18 = vmul.f32 0.5, %v1132_v2  ;;  %v992_v5 = vadd.f32 %v1326_v47, %v2340_v17  ;;  %v1327_v7 = vpop.f32.mrb[44].mxu1 }
 0x2d5   :  { %v1407_v53 = vpop.f32.mrb[76].mxu0  ;;  %1255 = vst.msk [vmem:[%s2429_s7] sm:$0xff] %vm1254_vm0, %v1238_v11  ;;  %v1223_v54 = vadd.f32 1.0, %v1684_v14  ;;  %v1328_v8 = vpop.f32.mrb[45].mxu1 }
 0x2d6   :  { %v1408_v10 = vpop.f32.mrb[77].mxu0  ;;  %1689 = vtanh.f32 %v1194_v18  ;;  %v1137_v55 = vadd.f32 %v1406_v3, %v992_v5  ;;  %v1329_v56 = vadd.f32 %v1328_v8, %v1327_v7 }
 0x2d7   :  { %v1409_v13 = vadd.f32 %v1408_v10, %v1407_v53  ;;  %v1239_v30 = vmul.f32 0.5, %v1223_v54 }
 0x2d8   :  { %v1686_v20 = vpop.eup %1685  ;;  %v1195_v21 = vmul.f32 0.5, %v1137_v55  ;;  %v997_v22 = vadd.f32 %v1329_v56, %v2340_v17  ;;  %v1330_v23 = vpop.f32.mrb[46].mxu1 }
 0x2d9   :  { %v1410_v37 = vpop.f32.mrb[78].mxu0  ;;  %1256 = vst.msk [vmem:[%s2429_s7 + $0x8] sm:$0xff] %vm1254_vm0, %v1239_v30  ;;  %v1224_v24 = vadd.f32 1.0, %v1686_v20  ;;  %v1331_v25 = vpop.f32.mrb[47].mxu1 }
 0x2da   :  { %v1411_v26 = vpop.f32.mrb[79].mxu0  ;;  %1691 = vtanh.f32 %v1195_v21  ;;  %v1142_v27 = vadd.f32 %v1409_v13, %v997_v22  ;;  %v1332_v28 = vadd.f32 %v1331_v25, %v1330_v23 }
 0x2db   :  { %v1412_v50 = vadd.f32 %v1411_v26, %v1410_v37  ;;  %v1240_v29 = vmul.f32 0.5, %v1224_v24 }
 0x2dc   :  { %v1688_v31 = vpop.eup %1687  ;;  %v1196_v32 = vmul.f32 0.5, %v1142_v27  ;;  %v1002_v33 = vadd.f32 %v1332_v28, %v2340_v17  ;;  %v1333_v34 = vpop.f32.mrb[48].mxu1 }
 0x2dd   :  { %v1413_v57 = vpop.f32.mrb[80].mxu0  ;;  %1257 = vst.msk [vmem:[%s2429_s7 + $0x10] sm:$0xff] %vm1254_vm0, %v1240_v29  ;;  %v1225_v35 = vadd.f32 1.0, %v1688_v31  ;;  %v1334_v36 = vpop.f32.mrb[49].mxu1 }
 0x2de   :  { %v1414_v38 = vpop.f32.mrb[81].mxu0  ;;  %1693 = vtanh.f32 %v1196_v32  ;;  %v1147_v39 = vadd.f32 %v1412_v50, %v1002_v33  ;;  %v1335_v41 = vadd.f32 %v1334_v36, %v1333_v34 }
 0x2df   :  { %v1415_v4 = vadd.f32 %v1414_v38, %v1413_v57  ;;  %v1241_v15 = vmul.f32 0.5, %v1225_v35 }
 0x2e0   :  { %v1690_v40 = vpop.eup %1689  ;;  %v1197_v16 = vmul.f32 0.5, %v1147_v39  ;;  %v1007_v43 = vadd.f32 %v1335_v41, %v2340_v17  ;;  %v1336_v45 = vpop.f32.mrb[50].mxu1 }
 0x2e1   :  { %v1416_v19 = vpop.f32.mrb[82].mxu0  ;;  %1258 = vst.msk [vmem:[%s2429_s7 + $0x18] sm:$0xff] %vm1254_vm0, %v1241_v15  ;;  %v1226_v46 = vadd.f32 1.0, %v1690_v40  ;;  %v1337_v48 = vpop.f32.mrb[51].mxu1 }
 0x2e2   :  { %v1417_v52 = vpop.f32.mrb[83].mxu0  ;;  %1695 = vtanh.f32 %v1197_v16  ;;  %v1152_v49 = vadd.f32 %v1415_v4, %v1007_v43  ;;  %v1338_v51 = vadd.f32 %v1337_v48, %v1336_v45 }
 0x2e3   :  { %v1418_v42 = vadd.f32 %v1417_v52, %v1416_v19  ;;  %v1242_v59 = vmul.f32 0.5, %v1226_v46 }
 0x2e4   :  { %v1692_v60 = vpop.eup %1691  ;;  %v1198_v9 = vmul.f32 0.5, %v1152_v49  ;;  %v1012_v58 = vadd.f32 %v1338_v51, %v2340_v17  ;;  %v1339_v61 = vpop.f32.mrb[52].mxu1 }
 0x2e5   :  { %v1419_v44 = vpop.f32.mrb[84].mxu0  ;;  %1259 = vst.msk [vmem:[%s2429_s7 + $0x20] sm:$0xff] %vm1254_vm0, %v1242_v59  ;;  %v1227_v0 = vadd.f32 1.0, %v1692_v60  ;;  %v1340_v62 = vpop.f32.mrb[53].mxu1 }
 0x2e6   :  { %v1420_v63 = vpop.f32.mrb[85].mxu0  ;;  %1697 = vtanh.f32 %v1198_v9  ;;  %v1157_v12 = vadd.f32 %v1418_v42, %v1012_v58  ;;  %v1341_v6 = vadd.f32 %v1340_v62, %v1339_v61 }
 0x2e7   :  { %v1421_v1 = vadd.f32 %v1420_v63, %v1419_v44  ;;  %v1243_v2 = vmul.f32 0.5, %v1227_v0 }
 0x2e8   :  { %v1694_v47 = vpop.eup %1693  ;;  %v1199_v3 = vmul.f32 0.5, %v1157_v12  ;;  %v1017_v11 = vadd.f32 %v1341_v6, %v2340_v17  ;;  %v1342_v14 = vpop.f32.mrb[54].mxu1 }
 0x2e9   :  { %v1422_v18 = vpop.f32.mrb[86].mxu0  ;;  %1260 = vst.msk [vmem:[%s2429_s7 + $0x28] sm:$0xff] %vm1254_vm0, %v1243_v2  ;;  %v1228_v5 = vadd.f32 1.0, %v1694_v47  ;;  %v1343_v7 = vpop.f32.mrb[55].mxu1 }
 0x2ea   :  { %v1423_v53 = vpop.f32.mrb[87].mxu0  ;;  %1699 = vtanh.f32 %v1199_v3  ;;  %v1162_v54 = vadd.f32 %v1421_v1, %v1017_v11  ;;  %v1344_v8 = vadd.f32 %v1343_v7, %v1342_v14 }
 0x2eb   :  { %v1424_v10 = vadd.f32 %v1423_v53, %v1422_v18  ;;  %v1244_v55 = vmul.f32 0.5, %v1228_v5 }
 0x2ec   :  { %v1696_v56 = vpop.eup %1695  ;;  %v1200_v13 = vmul.f32 0.5, %v1162_v54  ;;  %v1022_v30 = vadd.f32 %v1344_v8, %v2340_v17  ;;  %v1345_v20 = vpop.f32.mrb[56].mxu1 }
 0x2ed   :  { %1261 = vst.msk [vmem:[%s2429_s7 + $0x30] sm:$0xff] %vm1254_vm0, %v1244_v55  ;;  %v1229_v21 = vadd.f32 1.0, %v1696_v56  ;;  %v1346_v22 = vpop.f32.mrb[57].mxu1 }
 0x2ee   :  { %1701 = vtanh.f32 %v1200_v13  ;;  %v1167_v23 = vadd.f32 %v1424_v10, %v1022_v30  ;;  %v1347_v37 = vadd.f32 %v1346_v22, %v1345_v20 }
 0x2ef   :  { %v1245_v24 = vmul.f32 0.5, %v1229_v21 }
 0x2f0   :  { %v1698_v25 = vpop.eup %1697  ;;  %v1201_v26 = vmul.f32 0.5, %v1167_v23  ;;  %v1348_v27 = vpop.f32.mrb[58].mxu1  ;;  %v1027_v49 = vadd.f32 %v1347_v37, %v2340_v17 }
 0x2f1   :  { %1262 = vst.msk [vmem:[%s2429_s7 + $0x38] sm:$0xff] %vm1254_vm0, %v1245_v24  ;;  %v1230_v28 = vadd.f32 1.0, %v1698_v25  ;;  %v1349_v50 = vpop.f32.mrb[59].mxu1 }
 0x2f2   :  { %1703 = vtanh.f32 %v1201_v26  ;;  %v1350_v29 = vadd.f32 %v1349_v50, %v1348_v27 }
 0x2f3   :  { %v1246_v31 = vmul.f32 0.5, %v1230_v28 }
 0x2f4   :  { %v1700_v32 = vpop.eup %1699  ;;  %v1032_v33 = vadd.f32 %v1350_v29, %v2340_v17  ;;  %v1351_v34 = vpop.f32.mrb[60].mxu1 }
 0x2f5   :  { %1263 = vst.msk [vmem:[%s2429_s7 + $0x40] sm:$0xff] %vm1254_vm0, %v1246_v31  ;;  %v1231_v57 = vadd.f32 1.0, %v1700_v32  ;;  %v1352_v35 = vpop.f32.mrb[61].mxu1 }
 0x2f6   :  { %v1353_v36 = vadd.f32 %v1352_v35, %v1351_v34 }
 0x2f7   :  { %v1247_v38 = vmul.f32 0.5, %v1231_v57 }
 0x2f8   :  { %v1702_v39 = vpop.eup %1701  ;;  %v1037_v41 = vadd.f32 %v1353_v36, %v2340_v17  ;;  %v1354_v4 = vpop.f32.mrb[62].mxu1 }
 0x2f9   :  { %1264 = vst.msk [vmem:[%s2429_s7 + $0x48] sm:$0xff] %vm1254_vm0, %v1247_v38  ;;  %v1232_v15 = vadd.f32 1.0, %v1702_v39  ;;  %v1355_v40 = vpop.f32.mrb[63].mxu1 }
 0x2fa   :  { %v1356_v16 = vadd.f32 %v1355_v40, %v1354_v4 }
 0x2fb   :  { %v1248_v43 = vmul.f32 0.5, %v1232_v15 }
 0x2fc   :  { %v1704_v45 = vpop.eup %1703  ;;  %v1042_v19 = vadd.f32 %v1356_v16, %v2340_v17  ;;  %v1425_v46 = vpop.f32.mrb[64].mxu1 }
 0x2fd   :  { %1265 = vst.msk [vmem:[%s2429_s7 + $0x50] sm:$0xff] %vm1254_vm0, %v1248_v43  ;;  %v1233_v48 = vadd.f32 1.0, %v1704_v45  ;;  %v1426_v52 = vpop.f32.mrb[65].mxu1 }
 0x2fe   :  { %v1427_v51 = vadd.f32 %v1426_v52, %v1425_v46 }
 0x2ff   :  { %v1249_v42 = vmul.f32 0.5, %v1233_v48 }
 0x300   :  { %v1172_v59 = vadd.f32 %v1427_v51, %v1027_v49  ;;  %v1428_v60 = vpop.f32.mrb[66].mxu1 }
 0x301   :  { %1266 = vst.msk [vmem:[%s2429_s7 + $0x58] sm:$0xff] %vm1254_vm0, %v1249_v42  ;;  %v1429_v9 = vpop.f32.mrb[67].mxu1 }
 0x302   :  { %v1202_v58 = vmul.f32 0.5, %v1172_v59  ;;  %v1430_v61 = vadd.f32 %v1429_v9, %v1428_v60 }
 0x304   :  { %1705 = vtanh.f32 %v1202_v58  ;;  %v1177_v44 = vadd.f32 %v1430_v61, %v1032_v33  ;;  %v1431_v0 = vpop.f32.mrb[68].mxu1 }
 0x305   :  { %v1432_v62 = vpop.f32.mrb[69].mxu1 }
 0x306   :  { %v1203_v63 = vmul.f32 0.5, %v1177_v44  ;;  %v1433_v12 = vadd.f32 %v1432_v62, %v1431_v0 }
 0x308   :  { %1707 = vtanh.f32 %v1203_v63  ;;  %v1182_v17 = vadd.f32 %v1433_v12, %v1037_v41  ;;  %v1434_v6 = vpop.f32.mrb[70].mxu1 }
 0x309   :  { %v1435_v1 = vpop.f32.mrb[71].mxu1 }
 0x30a   :  { %v1204_v2 = vmul.f32 0.5, %v1182_v17  ;;  %v1436_v47 = vadd.f32 %v1435_v1, %v1434_v6 }
 0x30c   :  { %1709 = vtanh.f32 %v1204_v2  ;;  %v1187_v3 = vadd.f32 %v1436_v47, %v1042_v19 }
 0x30e   :  { %v1706_v11 = vpop.eup %1705  ;;  %v1205_v14 = vmul.f32 0.5, %v1187_v3 }
 0x30f   :  { %v1234_v18 = vadd.f32 1.0, %v1706_v11 }
 0x310   :  { %1711 = vtanh.f32 %v1205_v14 }
 0x311   :  { %v1250_v5 = vmul.f32 0.5, %v1234_v18 }
 0x312   :  { %v1708_v7 = vpop.eup %1707 }
 0x313   :  { %1267 = vst.msk [vmem:[%s2429_s7 + $0x60] sm:$0xff] %vm1254_vm0, %v1250_v5  ;;  %v1235_v53 = vadd.f32 1.0, %v1708_v7 }
 0x315   :  { %v1251_v54 = vmul.f32 0.5, %v1235_v53 }
 0x316   :  { %v1710_v8 = vpop.eup %1709 }
 0x317   :  { %1268 = vst.msk [vmem:[%s2429_s7 + $0x68] sm:$0xff] %vm1254_vm0, %v1251_v54  ;;  %v1236_v10 = vadd.f32 1.0, %v1710_v8 }
 0x319   :  { %v1252_v55 = vmul.f32 0.5, %v1236_v10 }
 0x31a   :  { %v1712_v56 = vpop.eup %1711 }
 0x31b   :  { %1269 = vst.msk [vmem:[%s2429_s7 + $0x70] sm:$0xff] %vm1254_vm0, %v1252_v55  ;;  %v1237_v13 = vadd.f32 1.0, %v1712_v56 }
 0x31d   :  { %v1253_v30 = vmul.f32 0.5, %v1237_v13 }
 0x31f   :  { %1270 = vst.msk [vmem:[%s2429_s7 + $0x78] sm:$0xff] %vm1254_vm0, %v1253_v30 }
 0x320   :  { %1275 = vsyncpa [#allocation3], 1 }

</bundles_post_ra>
